<compile_context>
chip_gen: v6e
topology: v6e:2x2x1
jax: 0.10.0
libtpu: 0.0.40
codegen_flags: <defaults>
</compile_context>

<pallas_src>
import functools
import math

import numpy as np
import jax
import jax.numpy as jnp
from jax.experimental import pallas as pl
from jax.experimental.pallas import tpu as pltpu


# ----------------------------- in-kernel math helpers ------------------------

def _layer_norm(x, gamma, beta, eps):
    mu = jnp.mean(x, axis=-1, keepdims=True)
    xc = x - mu
    var = jnp.mean(xc * xc, axis=-1, keepdims=True)
    return xc * jax.lax.rsqrt(var + eps) * gamma + beta


def _erf(x):
    # Abramowitz & Stegun 7.1.26 (|abs err| < 1.5e-7), built only from ops with
    # guaranteed Mosaic lowerings (exp / mul / add / select).
    a1, a2, a3, a4, a5 = (0.254829592, -0.284496736, 1.421413741,
                          -1.453152027, 1.061405429)
    p = 0.3275911
    ax = jnp.abs(x)
    t = 1.0 / (1.0 + p * ax)
    poly = ((((a5 * t + a4) * t + a3) * t + a2) * t + a1) * t
    y = 1.0 - poly * jnp.exp(-ax * ax)
    return jnp.where(x < 0.0, -y, y)


def _gelu_exact(x):
    # RecBole 'gelu': x * 0.5 * (1 + erf(x / sqrt(2)))
    return x * 0.5 * (1.0 + _erf(x * (1.0 / math.sqrt(2.0))))


def _rope_rotate(xh, cosF, sinF, hd2, use_roll):
    # xh: one head in NeoX layout [re...|im...]; cosF=[cos|cos], sinF=[-sin|sin].
    # The rotation needs the swapped vector [im|re]:
    #   * head_dim % 128 == 0  -> pltpu.roll (XLU lane-block rotate, off the VPU slot)
    #   * smaller heads        -> both halves live in one vreg; a concat of the
    #     sub-vreg halves lowers to the same cheap lane blend and avoids
    #     roll-on-partial-vreg lowering corner cases.
    if use_roll:
        swapped = pltpu.roll(xh, hd2, axis=-1)
    else:
        swapped = jnp.concatenate([xh[:, hd2:], xh[:, :hd2]], axis=-1)
    return xh * cosF + swapped * sinF


# ----------------------------- Pallas kernel ---------------------------------

def transformer_layer_kernel(
        x_ref, mask_ref, cos_ref, sin_ref,
        wqkv_ref, bqkv_ref, wo_ref, bo_ref, ln1g_ref, ln1b_ref,
        w1_ref, b1_ref, w2_ref, b2_ref, ln2g_ref, ln2b_ref,
        out_ref, ctx_scratch,
        *, n_heads, head_dim, seq_len, batch_tile, eps):
    Bt, S, H, hd = batch_tile, seq_len, n_heads, head_dim
    hd2 = hd // 2
    M = Bt * S
    D = H * hd
    use_roll = (hd % 128 == 0)

    x_in = x_ref[...].reshape(M, D)                 # bf16 activations
    xb = x_in.astype(jnp.bfloat16)
    x32 = x_in.astype(jnp.float32)                  # residual path in f32
    mask = mask_ref[...]                            # (1|Bt, S, S) additive f32
    cosF = cos_ref[...]                             # (M, hd) f32: [cos | cos]
    sinF = sin_ref[...]                             # (M, hd) f32: [-sin | sin]

    # Fused Q/K/V projection: one MXU pass with N = 3D.  1/sqrt(head_dim) is
    # already folded into the q columns / bias host-side.
    qkv = jnp.dot(xb, wqkv_ref[...],
                  preferred_element_type=jnp.float32) + bqkv_ref[...]
    q = qkv[:, :D]
    k = qkv[:, D:2 * D]
    v = qkv[:, 2 * D:]

    # Per-head attention, batched over the Bt batch rows of this tile.
    for h in range(H):
        lo = h * hd
        qh = _rope_rotate(q[:, lo:lo + hd], cosF, sinF, hd2, use_roll)
        kh = _rope_rotate(k[:, lo:lo + hd], cosF, sinF, hd2, use_roll)
        qh = qh.reshape(Bt, S, hd).astype(jnp.bfloat16)
        kh = kh.reshape(Bt, S, hd).astype(jnp.bfloat16)
        vh = v[:, lo:lo + hd].reshape(Bt, S, hd).astype(jnp.bfloat16)

        # TODO(synk): for S >~ 1024 switch to an online-softmax (flash) loop
        # over K tiles instead of materializing (Bt, S, S) scores/probs.
        s = jnp.einsum('bqd,bkd->bqk', qh, kh,
                       preferred_element_type=jnp.float32) + mask
        s = s - jnp.max(s, axis=-1, keepdims=True)
        p = jnp.exp(s)
        p = p * pl.reciprocal(jnp.sum(p, axis=-1, keepdims=True), approx=True)

        ctx = jnp.einsum('bqk,bkd->bqd', p.astype(jnp.bfloat16), vh,
                         preferred_element_type=jnp.float32)       # (Bt,S,hd)
        ctx_scratch[:, lo:lo + hd] = ctx.reshape(M, hd).astype(jnp.bfloat16)

    ctx = ctx_scratch[...]                          # (M, D) bf16

    # Attention output projection + residual + LayerNorm (f32).
    attn = jnp.dot(ctx, wo_ref[...],
                   preferred_element_type=jnp.float32) + bo_ref[...]
    h1 = _layer_norm(attn + x32, ln1g_ref[...], ln1b_ref[...], eps)

    # Position-wise feed-forward + residual + LayerNorm.
    # TODO(synk): for D >= ~1024 (v7x 64 MiB VMEM) stream w1/w2 over an
    # I-tiled "arbitrary" grid axis instead of keeping them fully resident.
    ff = jnp.dot(h1.astype(jnp.bfloat16), w1_ref[...],
                 preferred_element_type=jnp.float32) + b1_ref[...]
    ff = _gelu_exact(ff)
    ff = jnp.dot(ff.astype(jnp.bfloat16), w2_ref[...],
                 preferred_element_type=jnp.float32) + b2_ref[...]
    out = _layer_norm(ff + h1, ln2g_ref[...], ln2b_ref[...], eps)

    out_ref[...] = out.reshape(Bt, S, D).astype(out_ref.dtype)


# ------------------------------ host-side prep --------------------------------

def _neox_perm(D, n_heads):
    """Within-head permutation: interleaved (2p, 2p+1) -> [re... | im...]."""
    hd = D // n_heads
    hd2 = hd // 2
    perm = []
    for h in range(n_heads):
        base = h * hd
        perm.extend(base + 2 * p for p in range(hd2))
        perm.extend(base + 2 * p + 1 for p in range(hd2))
    return np.asarray(perm, dtype=np.int64)


def prepare_layer_params(params, n_heads):
    """One-time weight prep (hoisted out of the forward path): NeoX column
    permutation of q/k, 1/sqrt(head_dim) folded into q, Q/K/V fused into one
    (D, 3D) bf16 weight, output/FFN weights cast to bf16."""
    D = params["wq"].shape[0]
    hd = D // n_heads
    perm = _neox_perm(D, n_heads)
    scale = 1.0 / math.sqrt(hd)
    wq = params["wq"][:, perm] * scale
    bq = params["bq"][:, perm] * scale
    wk = params["wk"][:, perm]
    bk = params["bk"][:, perm]
    wqkv = jnp.concatenate([wq, wk, params["wv"]], axis=1).astype(jnp.bfloat16)
    bqkv = jnp.concatenate([bq, bk, params["bv"]], axis=1).astype(jnp.float32)
    return {
        "wqkv": wqkv, "bqkv": bqkv,
        "wo": params["wo"].astype(jnp.bfloat16), "bo": params["bo"],
        "ln1_g": params["ln1_g"], "ln1_b": params["ln1_b"],
        "w1": params["w1"].astype(jnp.bfloat16), "b1": params["b1"],
        "w2": params["w2"].astype(jnp.bfloat16), "b2": params["b2"],
        "ln2_g": params["ln2_g"], "ln2_b": params["ln2_b"],
    }


def prepare_rope(freqs_cos, freqs_sin, batch_tile, head_dim):
    """Full-width RoPE tables cosF=[cos|cos], sinF=[-sin|sin], tiled to the
    (Bt*S, head_dim) row layout used inside the kernel."""
    cosF = jnp.concatenate([freqs_cos, freqs_cos], axis=-1).astype(jnp.float32)
    sinF = jnp.concatenate([-freqs_sin, freqs_sin], axis=-1).astype(jnp.float32)
    return jnp.tile(cosF, (batch_tile, 1)), jnp.tile(sinF, (batch_tile, 1))


def _pick_batch_tile(B, S, row_target=512, min_grid=2):
    """Largest divisor Bt of B with Bt*S <= row_target (MXU-friendly M), while
    keeping the batch-tile grid >= min_grid so both v7x TensorCores get work.
    On v5e/v6e (128 MiB VMEM) row_target may be raised to ~1024."""
    best = 1
    for c in range(1, B + 1):
        if B % c:
            continue
        if c * S > max(row_target, S):
            continue
        if B >= min_grid and B // c < min_grid:
            continue
        best = c
    return best


def _vmem_limit_bytes(Bt, S, D, I, hd, mask_rows):
    """Scoped-VMEM limit sized to the actual resident set + in-kernel temps."""
    M = Bt * S
    bf16, f32 = 2, 4
    weights = ((3 * D * D + D * D + D * I + I * D) * bf16
               + (3 * D + D + I + D + 4 * D) * f32)
    rope = 2 * M * hd * f32
    mask = (S * S * f32) if mask_rows == 1 else (2 * Bt * S * S * f32)
    io = 2 * M * D * bf16 * 2                       # x / out, double-buffered
    scratch = M * D * bf16
    transient = (M * 3 * D * f32 + 3 * M * D * f32 + 2 * Bt * S * S * f32
                 + 3 * M * D * f32 + 2 * M * I * f32)
    need = weights + rope + mask + io + scratch + transient
    limit = int(need * 1.5) + (4 << 20)
    # Cap at the v7x per-core physical VMEM (64 MiB); v5e/v6e have 128 MiB and
    # the cap can be raised there for very large configs.
    return max(16 << 20, min(limit, 64 << 20))


def _const_index_map(ndim):
    return lambda b: (0,) * ndim


_SINGLE_BUFFER_CONSTS = None   # probed once: pl.Buffered(1) support on this JAX


def transformer_layer(x, mask, cosF, sinF, p, *, n_heads, layer_norm_eps,
                      batch_tile):
    global _SINGLE_BUFFER_CONSTS
    B, S, D = x.shape
    I = p["w1"].shape[1]
    hd = D // n_heads
    Bt = batch_tile
    M = Bt * S
    mask_rows = mask.shape[0]            # 1 (batch-invariant, e.g. causal) or B

    def make_specs(single_buffer):
        def const(shape):
            idx = _const_index_map(len(shape))
            if single_buffer:
                # Constant-index blocks are never re-fetched; a single buffer
                # (instead of the default 2) halves their resident VMEM.
                return pl.BlockSpec(shape, idx, pipeline_mode=pl.Buffered(1))
            return pl.BlockSpec(shape, idx)

        if mask_rows == 1:               # DMA the mask once, keep it resident
            mask_spec = const((1, S, S))
        else:                            # per-example mask: stream per tile
            mask_spec = pl.BlockSpec((Bt, S, S), lambda b: (b, 0, 0))

        return [
            pl.BlockSpec((Bt, S, D), lambda b: (b, 0, 0)),    # x (bf16)
            mask_spec,
            const((M, hd)), const((M, hd)),                   # cosF, sinF
            const((D, 3 * D)), const((1, 3 * D)),             # wqkv, bqkv
            const((D, D)), const((1, D)),                     # wo, bo
            const((1, D)), const((1, D)),                     # ln1 gamma, beta
            const((D, I)), const((1, I)),                     # w1, b1
            const((I, D)), const((1, D)),                     # w2, b2
            const((1, D)), const((1, D)),                     # ln2 gamma, beta
        ]

    kernel = functools.partial(
        transformer_layer_kernel, n_heads=n_heads, head_dim=hd, seq_len=S,
        batch_tile=Bt, eps=layer_norm_eps)

    operands = (x, mask, cosF, sinF,
                p["wqkv"], p["bqkv"], p["wo"], p["bo"], p["ln1_g"], p["ln1_b"],
                p["w1"], p["b1"], p["w2"], p["b2"], p["ln2_g"], p["ln2_b"])

    def call(single_buffer):
        return pl.pallas_call(
            kernel,
            out_shape=jax.ShapeDtypeStruct((B, S, D), jnp.bfloat16),
            grid=(B // Bt,),
            in_specs=make_specs(single_buffer),
            out_specs=pl.BlockSpec((Bt, S, D), lambda b: (b, 0, 0)),
            scratch_shapes=[pltpu.VMEM((M, D), jnp.bfloat16)],
            compiler_params=pltpu.CompilerParams(
                dimension_semantics=("parallel",),
                vmem_limit_bytes=_vmem_limit_bytes(Bt, S, D, I, hd, mask_rows)),
        )(*operands)

    if _SINGLE_BUFFER_CONSTS is None:
        try:
            out = call(True)
            _SINGLE_BUFFER_CONSTS = True
            return out
        except Exception:
            # pl.Buffered(1) unsupported on this JAX/libtpu combination;
            # fall back to default double-buffering (correctness unaffected).
            _SINGLE_BUFFER_CONSTS = False
    return call(_SINGLE_BUFFER_CONSTS)


def transformer_encoder(hidden_states, attention_mask, freqs_cos, freqs_sin,
                        layers_prepped, *, n_heads, layer_norm_eps,
                        output_all_encoded_layers=True, batch_tile=None):
    B, S, D = hidden_states.shape
    hd = D // n_heads
    if batch_tile is None:
        batch_tile = _pick_batch_tile(B, S)
    cosF, sinF = prepare_rope(freqs_cos, freqs_sin, batch_tile, hd)

    # Activations are carried between layers in bf16 (halves the per-layer HBM
    # read/write); residual + LayerNorm math stays f32 inside the kernel.
    h = hidden_states.astype(jnp.bfloat16)
    all_layers = []
    # TODO(synk): when output_all_encoded_layers=False, fuse all layers into a
    # single pallas_call (stacked weights + "arbitrary" layer grid axis with
    # the activation tile resident in VMEM) to drop per-layer HBM round trips.
    for p in layers_prepped:
        h = transformer_layer(h, attention_mask, cosF, sinF, p,
                              n_heads=n_heads, layer_norm_eps=layer_norm_eps,
                              batch_tile=batch_tile)
        if output_all_encoded_layers:
            all_layers.append(h)
    if not output_all_encoded_layers:
        all_layers.append(h)
    return all_layers


# --------------------------- parameters / reference ---------------------------

def init_layer_params(key, hidden_size, inner_size):
    ks = jax.random.split(key, 12)
    std = 0.02
    D, I = hidden_size, inner_size
    n = lambda k, shape: jax.random.normal(k, shape, jnp.float32) * std
    return {
        "wq": n(ks[0], (D, D)), "bq": n(ks[1], (1, D)),
        "wk": n(ks[2], (D, D)), "bk": n(ks[3], (1, D)),
        "wv": n(ks[4], (D, D)), "bv": n(ks[5], (1, D)),
        "wo": n(ks[6], (D, D)), "bo": n(ks[7], (1, D)),
        "ln1_g": 1.0 + 0.1 * jax.random.normal(ks[8], (1, D), jnp.float32),
        "ln1_b": 0.1 * jax.random.normal(ks[9], (1, D), jnp.float32),
        "w1": n(ks[10], (D, I)), "b1": jnp.zeros((1, I), jnp.float32),
        "w2": n(ks[11], (I, D)), "b2": jnp.zeros((1, D), jnp.float32),
        "ln2_g": jnp.ones((1, D), jnp.float32),
        "ln2_b": jnp.zeros((1, D), jnp.float32),
    }


def make_rope_freqs(seq_len, head_dim, theta=10000.0):
    # matches precompute_freqs_cis: freqs_cis[s, p] = exp(i * s * theta_p)
    half = head_dim // 2
    inv_freq = 1.0 / (theta ** (np.arange(0, half, dtype=np.float32) * 2.0 / head_dim))
    angles = np.arange(seq_len, dtype=np.float32)[:, None] * inv_freq[None, :]
    return jnp.asarray(np.cos(angles)), jnp.asarray(np.sin(angles))


def _ref_rope(x, cos, sin):
    # x: (B, S, H, hd) with interleaved (re, im) pairs; cos/sin: (S, hd//2)
    xr, xi = x[..., 0::2], x[..., 1::2]
    c = cos[None, :, None, :]
    s = sin[None, :, None, :]
    rr = xr * c - xi * s
    ri = xr * s + xi * c
    return jnp.stack([rr, ri], axis=-1).reshape(x.shape)


def reference_layer(x, mask, cos, sin, p, *, n_heads, eps):
    """Pure-JAX f32 reference of the torch TransformerLayer forward."""
    B, S, D = x.shape
    H = n_heads
    hd = D // H
    q = (x @ p["wq"] + p["bq"]).reshape(B, S, H, hd)
    k = (x @ p["wk"] + p["bk"]).reshape(B, S, H, hd)
    v = (x @ p["wv"] + p["bv"]).reshape(B, S, H, hd)
    q, k = _ref_rope(q, cos, sin), _ref_rope(k, cos, sin)
    q = q.transpose(0, 2, 1, 3)
    k = k.transpose(0, 2, 1, 3)
    v = v.transpose(0, 2, 1, 3)
    scores = jnp.einsum('bhqd,bhkd->bhqk', q, k) / math.sqrt(hd)
    scores = scores + mask[:, None, :, :]
    probs = jax.nn.softmax(scores, axis=-1)
    ctx = jnp.einsum('bhqk,bhkd->bhqd', probs, v)
    ctx = ctx.transpose(0, 2, 1, 3).reshape(B, S, D)
    attn = ctx @ p["wo"] + p["bo"]
    h1 = _layer_norm(attn + x, p["ln1_g"], p["ln1_b"], eps)
    ff = h1 @ p["w1"] + p["b1"]
    ff = jax.nn.gelu(ff, approximate=False)
    ff = ff @ p["w2"] + p["b2"]
    return _layer_norm(ff + h1, p["ln2_g"], p["ln2_b"], eps)


if __name__ == "__main__":
    # small shapes consistent with the module
    B, S = 2, 8
    n_layers, n_heads, hidden_size, inner_size = 2, 2, 32, 64
    layer_norm_eps = 1e-12
    head_dim = hidden_size // n_heads

    key = jax.random.PRNGKey(0)
    k_in, k_params = jax.random.split(key)
    hidden_states = jax.random.normal(k_in, (B, S, hidden_size), jnp.float32)

    # additive causal mask (batch-invariant -> passed once as (1, S, S))
    causal = np.tril(np.ones((S, S), np.float32))
    attention_mask = jnp.asarray(((1.0 - causal) * -1e9)[None])

    freqs_cos, freqs_sin = make_rope_freqs(S, head_dim)

    layer_keys = jax.random.split(k_params, n_layers)
    layers_raw = [init_layer_params(k, hidden_size, inner_size) for k in layer_keys]
    layers_prepped = [prepare_layer_params(p, n_heads) for p in layers_raw]

    outs = transformer_encoder(
        hidden_states, attention_mask, freqs_cos, freqs_sin, layers_prepped,
        n_heads=n_heads, layer_norm_eps=layer_norm_eps,
        output_all_encoded_layers=True)
    for o in outs:
        jax.block_until_ready(o)
    assert len(outs) == n_layers and outs[-1].shape == (B, S, hidden_size)

    # Loose-tolerance check against a pure-JAX f32 reference of the torch
    # module (bf16 weights/activations + approx reciprocal => ~1e-2 errors).
    h_ref = hidden_states
    for p in layers_raw:
        h_ref = reference_layer(h_ref, attention_mask, freqs_cos, freqs_sin, p,
                                n_heads=n_heads, eps=layer_norm_eps)
    err = float(jnp.max(jnp.abs(outs[-1].astype(jnp.float32) - h_ref)))
    assert err < 0.25, f"kernel/reference mismatch: max abs err {err}"
    print("KERNEL_OK")
</pallas_src>

<mosaic_0001>
module attributes {stable_mosaic.version = 11 : i64} {
  func.func @transformer_layer_kernel(%arg0: i32, %arg1: memref<1x8x32xbf16, #tpu.memory_space<vmem>>, %arg2: memref<1x8x8xf32, #tpu.memory_space<vmem>>, %arg3: memref<8x16xf32, #tpu.memory_space<vmem>>, %arg4: memref<8x16xf32, #tpu.memory_space<vmem>>, %arg5: memref<32x96xbf16, #tpu.memory_space<vmem>>, %arg6: memref<1x96xf32, #tpu.memory_space<vmem>>, %arg7: memref<32x32xbf16, #tpu.memory_space<vmem>>, %arg8: memref<1x32xf32, #tpu.memory_space<vmem>>, %arg9: memref<1x32xf32, #tpu.memory_space<vmem>>, %arg10: memref<1x32xf32, #tpu.memory_space<vmem>>, %arg11: memref<32x64xbf16, #tpu.memory_space<vmem>>, %arg12: memref<1x64xf32, #tpu.memory_space<vmem>>, %arg13: memref<64x32xbf16, #tpu.memory_space<vmem>>, %arg14: memref<1x32xf32, #tpu.memory_space<vmem>>, %arg15: memref<1x32xf32, #tpu.memory_space<vmem>>, %arg16: memref<1x32xf32, #tpu.memory_space<vmem>>, %arg17: memref<1x8x32xbf16, #tpu.memory_space<vmem>>, %arg18: memref<8x32xbf16, #tpu.memory_space<vmem>>) attributes {dimension_semantics = [#tpu.dimension_semantics<parallel>], iteration_bounds = array<i64: 2>, scalar_prefetch = 0 : i64, scratch_operands = 1 : i64, tpu.core_type = #tpu.core_type<tc>, window_params = [{transform_indices = @transform_0, window_bounds = array<i64: 1, 8, 32>}, {pipeline_mode = #tpu.pipeline_mode<synchronous>, transform_indices = @transform_1, window_bounds = array<i64: 1, 8, 8>}, {pipeline_mode = #tpu.pipeline_mode<synchronous>, transform_indices = @transform_2, window_bounds = array<i64: 8, 16>}, {pipeline_mode = #tpu.pipeline_mode<synchronous>, transform_indices = @transform_3, window_bounds = array<i64: 8, 16>}, {pipeline_mode = #tpu.pipeline_mode<synchronous>, transform_indices = @transform_4, window_bounds = array<i64: 32, 96>}, {pipeline_mode = #tpu.pipeline_mode<synchronous>, transform_indices = @transform_5, window_bounds = array<i64: 1, 96>}, {pipeline_mode = #tpu.pipeline_mode<synchronous>, transform_indices = @transform_6, window_bounds = array<i64: 32, 32>}, {pipeline_mode = #tpu.pipeline_mode<synchronous>, transform_indices = @transform_7, window_bounds = array<i64: 1, 32>}, {pipeline_mode = #tpu.pipeline_mode<synchronous>, transform_indices = @transform_8, window_bounds = array<i64: 1, 32>}, {pipeline_mode = #tpu.pipeline_mode<synchronous>, transform_indices = @transform_9, window_bounds = array<i64: 1, 32>}, {pipeline_mode = #tpu.pipeline_mode<synchronous>, transform_indices = @transform_10, window_bounds = array<i64: 32, 64>}, {pipeline_mode = #tpu.pipeline_mode<synchronous>, transform_indices = @transform_11, window_bounds = array<i64: 1, 64>}, {pipeline_mode = #tpu.pipeline_mode<synchronous>, transform_indices = @transform_12, window_bounds = array<i64: 64, 32>}, {pipeline_mode = #tpu.pipeline_mode<synchronous>, transform_indices = @transform_13, window_bounds = array<i64: 1, 32>}, {pipeline_mode = #tpu.pipeline_mode<synchronous>, transform_indices = @transform_14, window_bounds = array<i64: 1, 32>}, {pipeline_mode = #tpu.pipeline_mode<synchronous>, transform_indices = @transform_15, window_bounds = array<i64: 1, 32>}, {transform_indices = @transform_16, window_bounds = array<i64: 1, 8, 32>}]} {
    %c0 = arith.constant 0 : index
    %c0_0 = arith.constant 0 : index
    %c0_1 = arith.constant 0 : index
    %0 = vector.load %arg1[%c0, %c0_0, %c0_1] : memref<1x8x32xbf16, #tpu.memory_space<vmem>>, vector<1x8x32xbf16>
    %1 = vector.shape_cast %0 : vector<1x8x32xbf16> to vector<8x32xbf16>
    %2 = arith.extf %1 : vector<8x32xbf16> to vector<8x32xf32>
    %c0_2 = arith.constant 0 : index
    %c0_3 = arith.constant 0 : index
    %c0_4 = arith.constant 0 : index
    %3 = vector.load %arg2[%c0_2, %c0_3, %c0_4] : memref<1x8x8xf32, #tpu.memory_space<vmem>>, vector<1x8x8xf32>
    %c0_5 = arith.constant 0 : index
    %c0_6 = arith.constant 0 : index
    %4 = vector.load %arg3[%c0_5, %c0_6] : memref<8x16xf32, #tpu.memory_space<vmem>>, vector<8x16xf32>
    %c0_7 = arith.constant 0 : index
    %c0_8 = arith.constant 0 : index
    %5 = vector.load %arg4[%c0_7, %c0_8] : memref<8x16xf32, #tpu.memory_space<vmem>>, vector<8x16xf32>
    %c0_9 = arith.constant 0 : index
    %c0_10 = arith.constant 0 : index
    %6 = vector.load %arg5[%c0_9, %c0_10] : memref<32x96xbf16, #tpu.memory_space<vmem>>, vector<32x96xbf16>
    %cst = arith.constant dense<0.000000e+00> : vector<8x96xf32>
    %7 = tpu.matmul %1, %6, %cst {dimension_numbers = #tpu.dot_dimension_numbers<[1], [0], [0], [1], [0, 0, 1, 1], [], []>} : vector<8x32xbf16>, vector<32x96xbf16>, vector<8x96xf32> -> vector<8x96xf32>
    %c0_11 = arith.constant 0 : index
    %c0_12 = arith.constant 0 : index
    %8 = vector.load %arg6[%c0_11, %c0_12] : memref<1x96xf32, #tpu.memory_space<vmem>>, vector<1x96xf32>
    %9 = vector.broadcast %8 : vector<1x96xf32> to vector<8x96xf32>
    %10 = arith.addf %7, %9 : vector<8x96xf32>
    %11 = vector.extract_strided_slice %10 {offsets = [0, 0], sizes = [8, 32], strides = [1, 1]} : vector<8x96xf32> to vector<8x32xf32>
    %12 = vector.extract_strided_slice %10 {offsets = [0, 32], sizes = [8, 32], strides = [1, 1]} : vector<8x96xf32> to vector<8x32xf32>
    %13 = vector.extract_strided_slice %10 {offsets = [0, 64], sizes = [8, 32], strides = [1, 1]} : vector<8x96xf32> to vector<8x32xf32>
    %14 = vector.extract_strided_slice %11 {offsets = [0, 0], sizes = [8, 16], strides = [1, 1]} : vector<8x32xf32> to vector<8x16xf32>
    %15 = vector.extract_strided_slice %14 {offsets = [0, 8], sizes = [8, 8], strides = [1, 1]} : vector<8x16xf32> to vector<8x8xf32>
    %16 = vector.extract_strided_slice %14 {offsets = [0, 0], sizes = [8, 8], strides = [1, 1]} : vector<8x16xf32> to vector<8x8xf32>
    %17 = tpu.concatenate %15, %16 in 1 : vector<8x8xf32>, vector<8x8xf32> -> vector<8x16xf32>
    %18 = arith.mulf %14, %4 : vector<8x16xf32>
    %19 = arith.mulf %17, %5 : vector<8x16xf32>
    %20 = arith.addf %18, %19 : vector<8x16xf32>
    %21 = vector.extract_strided_slice %12 {offsets = [0, 0], sizes = [8, 16], strides = [1, 1]} : vector<8x32xf32> to vector<8x16xf32>
    %22 = vector.extract_strided_slice %21 {offsets = [0, 8], sizes = [8, 8], strides = [1, 1]} : vector<8x16xf32> to vector<8x8xf32>
    %23 = vector.extract_strided_slice %21 {offsets = [0, 0], sizes = [8, 8], strides = [1, 1]} : vector<8x16xf32> to vector<8x8xf32>
    %24 = tpu.concatenate %22, %23 in 1 : vector<8x8xf32>, vector<8x8xf32> -> vector<8x16xf32>
    %25 = arith.mulf %21, %4 : vector<8x16xf32>
    %26 = arith.mulf %24, %5 : vector<8x16xf32>
    %27 = arith.addf %25, %26 : vector<8x16xf32>
    %28 = vector.shape_cast %20 : vector<8x16xf32> to vector<1x8x16xf32>
    %29 = arith.truncf %28 : vector<1x8x16xf32> to vector<1x8x16xbf16>
    %30 = vector.shape_cast %27 : vector<8x16xf32> to vector<1x8x16xf32>
    %31 = arith.truncf %30 : vector<1x8x16xf32> to vector<1x8x16xbf16>
    %32 = vector.extract_strided_slice %13 {offsets = [0, 0], sizes = [8, 16], strides = [1, 1]} : vector<8x32xf32> to vector<8x16xf32>
    %33 = vector.shape_cast %32 : vector<8x16xf32> to vector<1x8x16xf32>
    %34 = arith.truncf %33 : vector<1x8x16xf32> to vector<1x8x16xbf16>
    "tpu.trace_start"() <{level = 10 : i32, message = "bqd,bkd->bqk"}> : () -> ()
    %cst_13 = arith.constant dense<0.000000e+00> : vector<1x8x8xf32>
    %35 = tpu.matmul %29, %31, %cst_13 {dimension_numbers = #tpu.dot_dimension_numbers<[2], [2], [1], [1], [0, 0, 0, 1, 1, 1], [0], [0]>} : vector<1x8x16xbf16>, vector<1x8x16xbf16>, vector<1x8x8xf32> -> vector<1x8x8xf32>
    "tpu.trace_stop"() : () -> ()
    %36 = arith.addf %35, %3 : vector<1x8x8xf32>
    %cst_14 = arith.constant dense<0xFF800000> : vector<1x8xf32>
    %37 = vector.multi_reduction <maximumf>, %36, %cst_14 [2] : vector<1x8x8xf32> to vector<1x8xf32>
    %38 = vector.shape_cast %37 : vector<1x8xf32> to vector<1x8x1xf32>
    %39 = vector.broadcast %38 : vector<1x8x1xf32> to vector<1x8x8xf32>
    %40 = arith.subf %36, %39 : vector<1x8x8xf32>
    %41 = math.exp %40 : vector<1x8x8xf32>
    %cst_15 = arith.constant dense<0.000000e+00> : vector<1x8xf32>
    %42 = vector.multi_reduction <add>, %41, %cst_15 [2] : vector<1x8x8xf32> to vector<1x8xf32>
    %43 = vector.shape_cast %42 : vector<1x8xf32> to vector<1x8x1xf32>
    %44 = tpu.reciprocal %43 {approx = true} : vector<1x8x1xf32> -> vector<1x8x1xf32>
    %45 = vector.broadcast %44 : vector<1x8x1xf32> to vector<1x8x8xf32>
    %46 = arith.mulf %41, %45 : vector<1x8x8xf32>
    %47 = arith.truncf %46 : vector<1x8x8xf32> to vector<1x8x8xbf16>
    "tpu.trace_start"() <{level = 10 : i32, message = "bqk,bkd->bqd"}> : () -> ()
    %cst_16 = arith.constant dense<0.000000e+00> : vector<1x8x16xf32>
    %48 = tpu.matmul %47, %34, %cst_16 {dimension_numbers = #tpu.dot_dimension_numbers<[2], [1], [1], [2], [0, 0, 0, 1, 1, 2], [0], [0]>} : vector<1x8x8xbf16>, vector<1x8x16xbf16>, vector<1x8x16xf32> -> vector<1x8x16xf32>
    "tpu.trace_stop"() : () -> ()
    %49 = vector.shape_cast %48 : vector<1x8x16xf32> to vector<8x16xf32>
    %50 = arith.truncf %49 : vector<8x16xf32> to vector<8x16xbf16>
    %c0_17 = arith.constant 0 : index
    %c0_18 = arith.constant 0 : index
    %51 = vector.load %arg18[%c0_17, %c0_18] : memref<8x32xbf16, #tpu.memory_space<vmem>>, vector<8x16xbf16>
    tpu.vector_store %arg18[%c0_17, %c0_18], %50 {strides = array<i32>} : memref<8x32xbf16, #tpu.memory_space<vmem>>, vector<8x16xbf16>,
    %52 = vector.extract_strided_slice %11 {offsets = [0, 16], sizes = [8, 16], strides = [1, 1]} : vector<8x32xf32> to vector<8x16xf32>
    %53 = vector.extract_strided_slice %52 {offsets = [0, 8], sizes = [8, 8], strides = [1, 1]} : vector<8x16xf32> to vector<8x8xf32>
    %54 = vector.extract_strided_slice %52 {offsets = [0, 0], sizes = [8, 8], strides = [1, 1]} : vector<8x16xf32> to vector<8x8xf32>
    %55 = tpu.concatenate %53, %54 in 1 : vector<8x8xf32>, vector<8x8xf32> -> vector<8x16xf32>
    %56 = arith.mulf %52, %4 : vector<8x16xf32>
    %57 = arith.mulf %55, %5 : vector<8x16xf32>
    %58 = arith.addf %56, %57 : vector<8x16xf32>
    %59 = vector.extract_strided_slice %12 {offsets = [0, 16], sizes = [8, 16], strides = [1, 1]} : vector<8x32xf32> to vector<8x16xf32>
    %60 = vector.extract_strided_slice %59 {offsets = [0, 8], sizes = [8, 8], strides = [1, 1]} : vector<8x16xf32> to vector<8x8xf32>
    %61 = vector.extract_strided_slice %59 {offsets = [0, 0], sizes = [8, 8], strides = [1, 1]} : vector<8x16xf32> to vector<8x8xf32>
    %62 = tpu.concatenate %60, %61 in 1 : vector<8x8xf32>, vector<8x8xf32> -> vector<8x16xf32>
    %63 = arith.mulf %59, %4 : vector<8x16xf32>
    %64 = arith.mulf %62, %5 : vector<8x16xf32>
    %65 = arith.addf %63, %64 : vector<8x16xf32>
    %66 = vector.shape_cast %58 : vector<8x16xf32> to vector<1x8x16xf32>
    %67 = arith.truncf %66 : vector<1x8x16xf32> to vector<1x8x16xbf16>
    %68 = vector.shape_cast %65 : vector<8x16xf32> to vector<1x8x16xf32>
    %69 = arith.truncf %68 : vector<1x8x16xf32> to vector<1x8x16xbf16>
    %70 = vector.extract_strided_slice %13 {offsets = [0, 16], sizes = [8, 16], strides = [1, 1]} : vector<8x32xf32> to vector<8x16xf32>
    %71 = vector.shape_cast %70 : vector<8x16xf32> to vector<1x8x16xf32>
    %72 = arith.truncf %71 : vector<1x8x16xf32> to vector<1x8x16xbf16>
    "tpu.trace_start"() <{level = 10 : i32, message = "bqd,bkd->bqk"}> : () -> ()
    %cst_19 = arith.constant dense<0.000000e+00> : vector<1x8x8xf32>
    %73 = tpu.matmul %67, %69, %cst_19 {dimension_numbers = #tpu.dot_dimension_numbers<[2], [2], [1], [1], [0, 0, 0, 1, 1, 1], [0], [0]>} : vector<1x8x16xbf16>, vector<1x8x16xbf16>, vector<1x8x8xf32> -> vector<1x8x8xf32>
    "tpu.trace_stop"() : () -> ()
    %74 = arith.addf %73, %3 : vector<1x8x8xf32>
    %cst_20 = arith.constant dense<0xFF800000> : vector<1x8xf32>
    %75 = vector.multi_reduction <maximumf>, %74, %cst_20 [2] : vector<1x8x8xf32> to vector<1x8xf32>
    %76 = vector.shape_cast %75 : vector<1x8xf32> to vector<1x8x1xf32>
    %77 = vector.broadcast %76 : vector<1x8x1xf32> to vector<1x8x8xf32>
    %78 = arith.subf %74, %77 : vector<1x8x8xf32>
    %79 = math.exp %78 : vector<1x8x8xf32>
    %cst_21 = arith.constant dense<0.000000e+00> : vector<1x8xf32>
    %80 = vector.multi_reduction <add>, %79, %cst_21 [2] : vector<1x8x8xf32> to vector<1x8xf32>
    %81 = vector.shape_cast %80 : vector<1x8xf32> to vector<1x8x1xf32>
    %82 = tpu.reciprocal %81 {approx = true} : vector<1x8x1xf32> -> vector<1x8x1xf32>
    %83 = vector.broadcast %82 : vector<1x8x1xf32> to vector<1x8x8xf32>
    %84 = arith.mulf %79, %83 : vector<1x8x8xf32>
    %85 = arith.truncf %84 : vector<1x8x8xf32> to vector<1x8x8xbf16>
    "tpu.trace_start"() <{level = 10 : i32, message = "bqk,bkd->bqd"}> : () -> ()
    %cst_22 = arith.constant dense<0.000000e+00> : vector<1x8x16xf32>
    %86 = tpu.matmul %85, %72, %cst_22 {dimension_numbers = #tpu.dot_dimension_numbers<[2], [1], [1], [2], [0, 0, 0, 1, 1, 2], [0], [0]>} : vector<1x8x8xbf16>, vector<1x8x16xbf16>, vector<1x8x16xf32> -> vector<1x8x16xf32>
    "tpu.trace_stop"() : () -> ()
    %87 = vector.shape_cast %86 : vector<1x8x16xf32> to vector<8x16xf32>
    %88 = arith.truncf %87 : vector<8x16xf32> to vector<8x16xbf16>
    %c0_23 = arith.constant 0 : index
    %c16 = arith.constant 16 : index
    %89 = vector.load %arg18[%c0_23, %c16] : memref<8x32xbf16, #tpu.memory_space<vmem>>, vector<8x16xbf16>
    tpu.vector_store %arg18[%c0_23, %c16], %88 {strides = array<i32>} : memref<8x32xbf16, #tpu.memory_space<vmem>>, vector<8x16xbf16>,
    %c0_24 = arith.constant 0 : index
    %c0_25 = arith.constant 0 : index
    %90 = vector.load %arg18[%c0_24, %c0_25] : memref<8x32xbf16, #tpu.memory_space<vmem>>, vector<8x32xbf16>
    %c0_26 = arith.constant 0 : index
    %c0_27 = arith.constant 0 : index
    %91 = vector.load %arg7[%c0_26, %c0_27] : memref<32x32xbf16, #tpu.memory_space<vmem>>, vector<32x32xbf16>
    %cst_28 = arith.constant dense<0.000000e+00> : vector<8x32xf32>
    %92 = tpu.matmul %90, %91, %cst_28 {dimension_numbers = #tpu.dot_dimension_numbers<[1], [0], [0], [1], [0, 0, 1, 1], [], []>} : vector<8x32xbf16>, vector<32x32xbf16>, vector<8x32xf32> -> vector<8x32xf32>
    %c0_29 = arith.constant 0 : index
    %c0_30 = arith.constant 0 : index
    %93 = vector.load %arg8[%c0_29, %c0_30] : memref<1x32xf32, #tpu.memory_space<vmem>>, vector<1x32xf32>
    %94 = vector.broadcast %93 : vector<1x32xf32> to vector<8x32xf32>
    %95 = arith.addf %92, %94 : vector<8x32xf32>
    %96 = arith.addf %95, %2 : vector<8x32xf32>
    %c0_31 = arith.constant 0 : index
    %c0_32 = arith.constant 0 : index
    %97 = vector.load %arg9[%c0_31, %c0_32] : memref<1x32xf32, #tpu.memory_space<vmem>>, vector<1x32xf32>
    %c0_33 = arith.constant 0 : index
    %c0_34 = arith.constant 0 : index
    %98 = vector.load %arg10[%c0_33, %c0_34] : memref<1x32xf32, #tpu.memory_space<vmem>>, vector<1x32xf32>
    %cst_35 = arith.constant dense<0.000000e+00> : vector<8xf32>
    %99 = vector.multi_reduction <add>, %96, %cst_35 [1] : vector<8x32xf32> to vector<8xf32>
    %100 = vector.shape_cast %99 : vector<8xf32> to vector<8x1xf32>
    %cst_36 = arith.constant 3.200000e+01 : f32
    %101 = vector.broadcast %cst_36 : f32 to vector<8x1xf32>
    %102 = arith.divf %100, %101 : vector<8x1xf32>
    %103 = vector.broadcast %102 : vector<8x1xf32> to vector<8x32xf32>
    %104 = arith.subf %96, %103 : vector<8x32xf32>
    %105 = arith.mulf %104, %104 : vector<8x32xf32>
    %cst_37 = arith.constant dense<0.000000e+00> : vector<8xf32>
    %106 = vector.multi_reduction <add>, %105, %cst_37 [1] : vector<8x32xf32> to vector<8xf32>
    %107 = vector.shape_cast %106 : vector<8xf32> to vector<8x1xf32>
    %cst_38 = arith.constant 3.200000e+01 : f32
    %108 = vector.broadcast %cst_38 : f32 to vector<8x1xf32>
    %109 = arith.divf %107, %108 : vector<8x1xf32>
    %cst_39 = arith.constant 9.99999996E-13 : f32
    %110 = vector.broadcast %cst_39 : f32 to vector<8x1xf32>
    %111 = arith.addf %109, %110 : vector<8x1xf32>
    %112 = math.rsqrt %111 : vector<8x1xf32>
    %113 = vector.broadcast %112 : vector<8x1xf32> to vector<8x32xf32>
    %114 = arith.mulf %104, %113 : vector<8x32xf32>
    %115 = vector.broadcast %97 : vector<1x32xf32> to vector<8x32xf32>
    %116 = arith.mulf %114, %115 : vector<8x32xf32>
    %117 = vector.broadcast %98 : vector<1x32xf32> to vector<8x32xf32>
    %118 = arith.addf %116, %117 : vector<8x32xf32>
    %119 = arith.truncf %118 : vector<8x32xf32> to vector<8x32xbf16>
    %c0_40 = arith.constant 0 : index
    %c0_41 = arith.constant 0 : index
    %120 = vector.load %arg11[%c0_40, %c0_41] : memref<32x64xbf16, #tpu.memory_space<vmem>>, vector<32x64xbf16>
    %cst_42 = arith.constant dense<0.000000e+00> : vector<8x64xf32>
    %121 = tpu.matmul %119, %120, %cst_42 {dimension_numbers = #tpu.dot_dimension_numbers<[1], [0], [0], [1], [0, 0, 1, 1], [], []>} : vector<8x32xbf16>, vector<32x64xbf16>, vector<8x64xf32> -> vector<8x64xf32>
    %c0_43 = arith.constant 0 : index
    %c0_44 = arith.constant 0 : index
    %122 = vector.load %arg12[%c0_43, %c0_44] : memref<1x64xf32, #tpu.memory_space<vmem>>, vector<1x64xf32>
    %123 = vector.broadcast %122 : vector<1x64xf32> to vector<8x64xf32>
    %124 = arith.addf %121, %123 : vector<8x64xf32>
    %cst_45 = arith.constant 5.000000e-01 : f32
    %125 = vector.broadcast %cst_45 : f32 to vector<8x64xf32>
    %126 = arith.mulf %124, %125 : vector<8x64xf32>
    %cst_46 = arith.constant 0.707106769 : f32
    %127 = vector.broadcast %cst_46 : f32 to vector<8x64xf32>
    %128 = arith.mulf %124, %127 : vector<8x64xf32>
    %129 = math.absf %128 : vector<8x64xf32>
    %cst_47 = arith.constant 0.327591091 : f32
    %130 = vector.broadcast %cst_47 : f32 to vector<8x64xf32>
    %131 = arith.mulf %130, %129 : vector<8x64xf32>
    %cst_48 = arith.constant 1.000000e+00 : f32
    %132 = vector.broadcast %cst_48 : f32 to vector<8x64xf32>
    %133 = arith.addf %132, %131 : vector<8x64xf32>
    %cst_49 = arith.constant 1.000000e+00 : f32
    %134 = vector.broadcast %cst_49 : f32 to vector<8x64xf32>
    %135 = arith.divf %134, %133 : vector<8x64xf32>
    %cst_50 = arith.constant 1.06140542 : f32
    %136 = vector.broadcast %cst_50 : f32 to vector<8x64xf32>
    %137 = arith.mulf %136, %135 : vector<8x64xf32>
    %cst_51 = arith.constant -1.45315206 : f32
    %138 = vector.broadcast %cst_51 : f32 to vector<8x64xf32>
    %139 = arith.addf %137, %138 : vector<8x64xf32>
    %140 = arith.mulf %139, %135 : vector<8x64xf32>
    %cst_52 = arith.constant 1.42141378 : f32
    %141 = vector.broadcast %cst_52 : f32 to vector<8x64xf32>
    %142 = arith.addf %140, %141 : vector<8x64xf32>
    %143 = arith.mulf %142, %135 : vector<8x64xf32>
    %cst_53 = arith.constant -0.284496725 : f32
    %144 = vector.broadcast %cst_53 : f32 to vector<8x64xf32>
    %145 = arith.addf %143, %144 : vector<8x64xf32>
    %146 = arith.mulf %145, %135 : vector<8x64xf32>
    %cst_54 = arith.constant 0.254829586 : f32
    %147 = vector.broadcast %cst_54 : f32 to vector<8x64xf32>
    %148 = arith.addf %146, %147 : vector<8x64xf32>
    %149 = arith.mulf %148, %135 : vector<8x64xf32>
    %cst_55 = arith.constant 0.000000e+00 : f32
    %150 = vector.broadcast %cst_55 : f32 to vector<8x64xf32>
    %151 = arith.subf %150, %129 : vector<8x64xf32>
    %152 = arith.mulf %151, %129 : vector<8x64xf32>
    %153 = math.exp %152 : vector<8x64xf32>
    %154 = arith.mulf %149, %153 : vector<8x64xf32>
    %cst_56 = arith.constant 1.000000e+00 : f32
    %155 = vector.broadcast %cst_56 : f32 to vector<8x64xf32>
    %156 = arith.subf %155, %154 : vector<8x64xf32>
    %cst_57 = arith.constant 0.000000e+00 : f32
    %157 = vector.broadcast %cst_57 : f32 to vector<8x64xf32>
    %158 = arith.cmpf olt, %128, %157 : vector<8x64xf32>
    %cst_58 = arith.constant 0.000000e+00 : f32
    %159 = vector.broadcast %cst_58 : f32 to vector<8x64xf32>
    %160 = arith.subf %159, %156 : vector<8x64xf32>
    %161 = arith.select %158, %160, %156 : vector<8x64xi1>, vector<8x64xf32>
    %cst_59 = arith.constant 1.000000e+00 : f32
    %162 = vector.broadcast %cst_59 : f32 to vector<8x64xf32>
    %163 = arith.addf %162, %161 : vector<8x64xf32>
    %164 = arith.mulf %126, %163 : vector<8x64xf32>
    %165 = arith.truncf %164 : vector<8x64xf32> to vector<8x64xbf16>
    %c0_60 = arith.constant 0 : index
    %c0_61 = arith.constant 0 : index
    %166 = vector.load %arg13[%c0_60, %c0_61] : memref<64x32xbf16, #tpu.memory_space<vmem>>, vector<64x32xbf16>
    %cst_62 = arith.constant dense<0.000000e+00> : vector<8x32xf32>
    %167 = tpu.matmul %165, %166, %cst_62 {dimension_numbers = #tpu.dot_dimension_numbers<[1], [0], [0], [1], [0, 0, 1, 1], [], []>} : vector<8x64xbf16>, vector<64x32xbf16>, vector<8x32xf32> -> vector<8x32xf32>
    %c0_63 = arith.constant 0 : index
    %c0_64 = arith.constant 0 : index
    %168 = vector.load %arg14[%c0_63, %c0_64] : memref<1x32xf32, #tpu.memory_space<vmem>>, vector<1x32xf32>
    %169 = vector.broadcast %168 : vector<1x32xf32> to vector<8x32xf32>
    %170 = arith.addf %167, %169 : vector<8x32xf32>
    %171 = arith.addf %170, %118 : vector<8x32xf32>
    %c0_65 = arith.constant 0 : index
    %c0_66 = arith.constant 0 : index
    %172 = vector.load %arg15[%c0_65, %c0_66] : memref<1x32xf32, #tpu.memory_space<vmem>>, vector<1x32xf32>
    %c0_67 = arith.constant 0 : index
    %c0_68 = arith.constant 0 : index
    %173 = vector.load %arg16[%c0_67, %c0_68] : memref<1x32xf32, #tpu.memory_space<vmem>>, vector<1x32xf32>
    %cst_69 = arith.constant dense<0.000000e+00> : vector<8xf32>
    %174 = vector.multi_reduction <add>, %171, %cst_69 [1] : vector<8x32xf32> to vector<8xf32>
    %175 = vector.shape_cast %174 : vector<8xf32> to vector<8x1xf32>
    %cst_70 = arith.constant 3.200000e+01 : f32
    %176 = vector.broadcast %cst_70 : f32 to vector<8x1xf32>
    %177 = arith.divf %175, %176 : vector<8x1xf32>
    %178 = vector.broadcast %177 : vector<8x1xf32> to vector<8x32xf32>
    %179 = arith.subf %171, %178 : vector<8x32xf32>
    %180 = arith.mulf %179, %179 : vector<8x32xf32>
    %cst_71 = arith.constant dense<0.000000e+00> : vector<8xf32>
    %181 = vector.multi_reduction <add>, %180, %cst_71 [1] : vector<8x32xf32> to vector<8xf32>
    %182 = vector.shape_cast %181 : vector<8xf32> to vector<8x1xf32>
    %cst_72 = arith.constant 3.200000e+01 : f32
    %183 = vector.broadcast %cst_72 : f32 to vector<8x1xf32>
    %184 = arith.divf %182, %183 : vector<8x1xf32>
    %cst_73 = arith.constant 9.99999996E-13 : f32
    %185 = vector.broadcast %cst_73 : f32 to vector<8x1xf32>
    %186 = arith.addf %184, %185 : vector<8x1xf32>
    %187 = math.rsqrt %186 : vector<8x1xf32>
    %188 = vector.broadcast %187 : vector<8x1xf32> to vector<8x32xf32>
    %189 = arith.mulf %179, %188 : vector<8x32xf32>
    %190 = vector.broadcast %172 : vector<1x32xf32> to vector<8x32xf32>
    %191 = arith.mulf %189, %190 : vector<8x32xf32>
    %192 = vector.broadcast %173 : vector<1x32xf32> to vector<8x32xf32>
    %193 = arith.addf %191, %192 : vector<8x32xf32>
    %194 = vector.shape_cast %193 : vector<8x32xf32> to vector<1x8x32xf32>
    %195 = arith.truncf %194 : vector<1x8x32xf32> to vector<1x8x32xbf16>
    %c0_74 = arith.constant 0 : index
    %c0_75 = arith.constant 0 : index
    %c0_76 = arith.constant 0 : index
    %196 = vector.load %arg17[%c0_74, %c0_75, %c0_76] : memref<1x8x32xbf16, #tpu.memory_space<vmem>>, vector<1x8x32xbf16>
    tpu.vector_store %arg17[%c0_74, %c0_75, %c0_76], %195 {strides = array<i32>} : memref<1x8x32xbf16, #tpu.memory_space<vmem>>, vector<1x8x32xbf16>,
    return
  }
  func.func @transform_0(%arg0: i32) -> (i32, i32, i32) {
    %c0_i32 = arith.constant 0 : i32
    %c0_i32_0 = arith.constant 0 : i32
    %c0_i32_1 = arith.constant 0 : i32
    return %arg0, %c0_i32, %c0_i32_0 : i32, i32, i32
  }
  func.func @transform_1(%arg0: i32) -> (i32, i32, i32) {
    %c0_i32 = arith.constant 0 : i32
    %c0_i32_0 = arith.constant 0 : i32
    %c0_i32_1 = arith.constant 0 : i32
    %c0_i32_2 = arith.constant 0 : i32
    return %c0_i32, %c0_i32_0, %c0_i32_1 : i32, i32, i32
  }
  func.func @transform_2(%arg0: i32) -> (i32, i32) {
    %c0_i32 = arith.constant 0 : i32
    %c0_i32_0 = arith.constant 0 : i32
    %c0_i32_1 = arith.constant 0 : i32
    return %c0_i32, %c0_i32_0 : i32, i32
  }
  func.func @transform_3(%arg0: i32) -> (i32, i32) {
    %c0_i32 = arith.constant 0 : i32
    %c0_i32_0 = arith.constant 0 : i32
    %c0_i32_1 = arith.constant 0 : i32
    return %c0_i32, %c0_i32_0 : i32, i32
  }
  func.func @transform_4(%arg0: i32) -> (i32, i32) {
    %c0_i32 = arith.constant 0 : i32
    %c0_i32_0 = arith.constant 0 : i32
    %c0_i32_1 = arith.constant 0 : i32
    return %c0_i32, %c0_i32_0 : i32, i32
  }
  func.func @transform_5(%arg0: i32) -> (i32, i32) {
    %c0_i32 = arith.constant 0 : i32
    %c0_i32_0 = arith.constant 0 : i32
    %c0_i32_1 = arith.constant 0 : i32
    return %c0_i32, %c0_i32_0 : i32, i32
  }
  func.func @transform_6(%arg0: i32) -> (i32, i32) {
    %c0_i32 = arith.constant 0 : i32
    %c0_i32_0 = arith.constant 0 : i32
    %c0_i32_1 = arith.constant 0 : i32
    return %c0_i32, %c0_i32_0 : i32, i32
  }
  func.func @transform_7(%arg0: i32) -> (i32, i32) {
    %c0_i32 = arith.constant 0 : i32
    %c0_i32_0 = arith.constant 0 : i32
    %c0_i32_1 = arith.constant 0 : i32
    return %c0_i32, %c0_i32_0 : i32, i32
  }
  func.func @transform_8(%arg0: i32) -> (i32, i32) {
    %c0_i32 = arith.constant 0 : i32
    %c0_i32_0 = arith.constant 0 : i32
    %c0_i32_1 = arith.constant 0 : i32
    return %c0_i32, %c0_i32_0 : i32, i32
  }
  func.func @transform_9(%arg0: i32) -> (i32, i32) {
    %c0_i32 = arith.constant 0 : i32
    %c0_i32_0 = arith.constant 0 : i32
    %c0_i32_1 = arith.constant 0 : i32
    return %c0_i32, %c0_i32_0 : i32, i32
  }
  func.func @transform_10(%arg0: i32) -> (i32, i32) {
    %c0_i32 = arith.constant 0 : i32
    %c0_i32_0 = arith.constant 0 : i32
    %c0_i32_1 = arith.constant 0 : i32
    return %c0_i32, %c0_i32_0 : i32, i32
  }
  func.func @transform_11(%arg0: i32) -> (i32, i32) {
    %c0_i32 = arith.constant 0 : i32
    %c0_i32_0 = arith.constant 0 : i32
    %c0_i32_1 = arith.constant 0 : i32
    return %c0_i32, %c0_i32_0 : i32, i32
  }
  func.func @transform_12(%arg0: i32) -> (i32, i32) {
    %c0_i32 = arith.constant 0 : i32
    %c0_i32_0 = arith.constant 0 : i32
    %c0_i32_1 = arith.constant 0 : i32
    return %c0_i32, %c0_i32_0 : i32, i32
  }
  func.func @transform_13(%arg0: i32) -> (i32, i32) {
    %c0_i32 = arith.constant 0 : i32
    %c0_i32_0 = arith.constant 0 : i32
    %c0_i32_1 = arith.constant 0 : i32
    return %c0_i32, %c0_i32_0 : i32, i32
  }
  func.func @transform_14(%arg0: i32) -> (i32, i32) {
    %c0_i32 = arith.constant 0 : i32
    %c0_i32_0 = arith.constant 0 : i32
    %c0_i32_1 = arith.constant 0 : i32
    return %c0_i32, %c0_i32_0 : i32, i32
  }
  func.func @transform_15(%arg0: i32) -> (i32, i32) {
    %c0_i32 = arith.constant 0 : i32
    %c0_i32_0 = arith.constant 0 : i32
    %c0_i32_1 = arith.constant 0 : i32
    return %c0_i32, %c0_i32_0 : i32, i32
  }
  func.func @transform_16(%arg0: i32) -> (i32, i32, i32) {
    %c0_i32 = arith.constant 0 : i32
    %c0_i32_0 = arith.constant 0 : i32
    %c0_i32_1 = arith.constant 0 : i32
    return %arg0, %c0_i32, %c0_i32_0 : i32, i32, i32
  }
}

module attributes {stable_mosaic.version = 11 : i64} {
  func.func @transformer_layer_kernel(%arg0: i32, %arg1: memref<1x8x32xbf16, #tpu.memory_space<vmem>>, %arg2: memref<1x8x8xf32, #tpu.memory_space<vmem>>, %arg3: memref<8x16xf32, #tpu.memory_space<vmem>>, %arg4: memref<8x16xf32, #tpu.memory_space<vmem>>, %arg5: memref<32x96xbf16, #tpu.memory_space<vmem>>, %arg6: memref<1x96xf32, #tpu.memory_space<vmem>>, %arg7: memref<32x32xbf16, #tpu.memory_space<vmem>>, %arg8: memref<1x32xf32, #tpu.memory_space<vmem>>, %arg9: memref<1x32xf32, #tpu.memory_space<vmem>>, %arg10: memref<1x32xf32, #tpu.memory_space<vmem>>, %arg11: memref<32x64xbf16, #tpu.memory_space<vmem>>, %arg12: memref<1x64xf32, #tpu.memory_space<vmem>>, %arg13: memref<64x32xbf16, #tpu.memory_space<vmem>>, %arg14: memref<1x32xf32, #tpu.memory_space<vmem>>, %arg15: memref<1x32xf32, #tpu.memory_space<vmem>>, %arg16: memref<1x32xf32, #tpu.memory_space<vmem>>, %arg17: memref<1x8x32xbf16, #tpu.memory_space<vmem>>, %arg18: memref<8x32xbf16, #tpu.memory_space<vmem>>) attributes {dimension_semantics = [#tpu.dimension_semantics<parallel>], iteration_bounds = array<i64: 2>, scalar_prefetch = 0 : i64, scratch_operands = 1 : i64, tpu.core_type = #tpu.core_type<tc>, window_params = [{transform_indices = @transform_0, window_bounds = array<i64: 1, 8, 32>}, {pipeline_mode = #tpu.pipeline_mode<synchronous>, transform_indices = @transform_1, window_bounds = array<i64: 1, 8, 8>}, {pipeline_mode = #tpu.pipeline_mode<synchronous>, transform_indices = @transform_2, window_bounds = array<i64: 8, 16>}, {pipeline_mode = #tpu.pipeline_mode<synchronous>, transform_indices = @transform_3, window_bounds = array<i64: 8, 16>}, {pipeline_mode = #tpu.pipeline_mode<synchronous>, transform_indices = @transform_4, window_bounds = array<i64: 32, 96>}, {pipeline_mode = #tpu.pipeline_mode<synchronous>, transform_indices = @transform_5, window_bounds = array<i64: 1, 96>}, {pipeline_mode = #tpu.pipeline_mode<synchronous>, transform_indices = @transform_6, window_bounds = array<i64: 32, 32>}, {pipeline_mode = #tpu.pipeline_mode<synchronous>, transform_indices = @transform_7, window_bounds = array<i64: 1, 32>}, {pipeline_mode = #tpu.pipeline_mode<synchronous>, transform_indices = @transform_8, window_bounds = array<i64: 1, 32>}, {pipeline_mode = #tpu.pipeline_mode<synchronous>, transform_indices = @transform_9, window_bounds = array<i64: 1, 32>}, {pipeline_mode = #tpu.pipeline_mode<synchronous>, transform_indices = @transform_10, window_bounds = array<i64: 32, 64>}, {pipeline_mode = #tpu.pipeline_mode<synchronous>, transform_indices = @transform_11, window_bounds = array<i64: 1, 64>}, {pipeline_mode = #tpu.pipeline_mode<synchronous>, transform_indices = @transform_12, window_bounds = array<i64: 64, 32>}, {pipeline_mode = #tpu.pipeline_mode<synchronous>, transform_indices = @transform_13, window_bounds = array<i64: 1, 32>}, {pipeline_mode = #tpu.pipeline_mode<synchronous>, transform_indices = @transform_14, window_bounds = array<i64: 1, 32>}, {pipeline_mode = #tpu.pipeline_mode<synchronous>, transform_indices = @transform_15, window_bounds = array<i64: 1, 32>}, {transform_indices = @transform_16, window_bounds = array<i64: 1, 8, 32>}]} {
    %c0 = arith.constant 0 : index
    %c0_0 = arith.constant 0 : index
    %c0_1 = arith.constant 0 : index
    %0 = vector.load %arg1[%c0, %c0_0, %c0_1] : memref<1x8x32xbf16, #tpu.memory_space<vmem>>, vector<1x8x32xbf16>
    %1 = vector.shape_cast %0 : vector<1x8x32xbf16> to vector<8x32xbf16>
    %2 = arith.extf %1 : vector<8x32xbf16> to vector<8x32xf32>
    %c0_2 = arith.constant 0 : index
    %c0_3 = arith.constant 0 : index
    %c0_4 = arith.constant 0 : index
    %3 = vector.load %arg2[%c0_2, %c0_3, %c0_4] : memref<1x8x8xf32, #tpu.memory_space<vmem>>, vector<1x8x8xf32>
    %c0_5 = arith.constant 0 : index
    %c0_6 = arith.constant 0 : index
    %4 = vector.load %arg3[%c0_5, %c0_6] : memref<8x16xf32, #tpu.memory_space<vmem>>, vector<8x16xf32>
    %c0_7 = arith.constant 0 : index
    %c0_8 = arith.constant 0 : index
    %5 = vector.load %arg4[%c0_7, %c0_8] : memref<8x16xf32, #tpu.memory_space<vmem>>, vector<8x16xf32>
    %c0_9 = arith.constant 0 : index
    %c0_10 = arith.constant 0 : index
    %6 = vector.load %arg5[%c0_9, %c0_10] : memref<32x96xbf16, #tpu.memory_space<vmem>>, vector<32x96xbf16>
    %cst = arith.constant dense<0.000000e+00> : vector<8x96xf32>
    %7 = tpu.matmul %1, %6, %cst {dimension_numbers = #tpu.dot_dimension_numbers<[1], [0], [0], [1], [0, 0, 1, 1], [], []>} : vector<8x32xbf16>, vector<32x96xbf16>, vector<8x96xf32> -> vector<8x96xf32>
    %c0_11 = arith.constant 0 : index
    %c0_12 = arith.constant 0 : index
    %8 = vector.load %arg6[%c0_11, %c0_12] : memref<1x96xf32, #tpu.memory_space<vmem>>, vector<1x96xf32>
    %9 = vector.broadcast %8 : vector<1x96xf32> to vector<8x96xf32>
    %10 = arith.addf %7, %9 : vector<8x96xf32>
    %11 = vector.extract_strided_slice %10 {offsets = [0, 0], sizes = [8, 32], strides = [1, 1]} : vector<8x96xf32> to vector<8x32xf32>
    %12 = vector.extract_strided_slice %10 {offsets = [0, 32], sizes = [8, 32], strides = [1, 1]} : vector<8x96xf32> to vector<8x32xf32>
    %13 = vector.extract_strided_slice %10 {offsets = [0, 64], sizes = [8, 32], strides = [1, 1]} : vector<8x96xf32> to vector<8x32xf32>
    %14 = vector.extract_strided_slice %11 {offsets = [0, 0], sizes = [8, 16], strides = [1, 1]} : vector<8x32xf32> to vector<8x16xf32>
    %15 = vector.extract_strided_slice %14 {offsets = [0, 8], sizes = [8, 8], strides = [1, 1]} : vector<8x16xf32> to vector<8x8xf32>
    %16 = vector.extract_strided_slice %14 {offsets = [0, 0], sizes = [8, 8], strides = [1, 1]} : vector<8x16xf32> to vector<8x8xf32>
    %17 = tpu.concatenate %15, %16 in 1 : vector<8x8xf32>, vector<8x8xf32> -> vector<8x16xf32>
    %18 = arith.mulf %14, %4 : vector<8x16xf32>
    %19 = arith.mulf %17, %5 : vector<8x16xf32>
    %20 = arith.addf %18, %19 : vector<8x16xf32>
    %21 = vector.extract_strided_slice %12 {offsets = [0, 0], sizes = [8, 16], strides = [1, 1]} : vector<8x32xf32> to vector<8x16xf32>
    %22 = vector.extract_strided_slice %21 {offsets = [0, 8], sizes = [8, 8], strides = [1, 1]} : vector<8x16xf32> to vector<8x8xf32>
    %23 = vector.extract_strided_slice %21 {offsets = [0, 0], sizes = [8, 8], strides = [1, 1]} : vector<8x16xf32> to vector<8x8xf32>
    %24 = tpu.concatenate %22, %23 in 1 : vector<8x8xf32>, vector<8x8xf32> -> vector<8x16xf32>
    %25 = arith.mulf %21, %4 : vector<8x16xf32>
    %26 = arith.mulf %24, %5 : vector<8x16xf32>
    %27 = arith.addf %25, %26 : vector<8x16xf32>
    %28 = vector.shape_cast %20 : vector<8x16xf32> to vector<1x8x16xf32>
    %29 = arith.truncf %28 : vector<1x8x16xf32> to vector<1x8x16xbf16>
    %30 = vector.shape_cast %27 : vector<8x16xf32> to vector<1x8x16xf32>
    %31 = arith.truncf %30 : vector<1x8x16xf32> to vector<1x8x16xbf16>
    %32 = vector.extract_strided_slice %13 {offsets = [0, 0], sizes = [8, 16], strides = [1, 1]} : vector<8x32xf32> to vector<8x16xf32>
    %33 = vector.shape_cast %32 : vector<8x16xf32> to vector<1x8x16xf32>
    %34 = arith.truncf %33 : vector<1x8x16xf32> to vector<1x8x16xbf16>
    "tpu.trace_start"() <{level = 10 : i32, message = "bqd,bkd->bqk"}> : () -> ()
    %cst_13 = arith.constant dense<0.000000e+00> : vector<1x8x8xf32>
    %35 = tpu.matmul %29, %31, %cst_13 {dimension_numbers = #tpu.dot_dimension_numbers<[2], [2], [1], [1], [0, 0, 0, 1, 1, 1], [0], [0]>} : vector<1x8x16xbf16>, vector<1x8x16xbf16>, vector<1x8x8xf32> -> vector<1x8x8xf32>
    "tpu.trace_stop"() : () -> ()
    %36 = arith.addf %35, %3 : vector<1x8x8xf32>
    %cst_14 = arith.constant dense<0xFF800000> : vector<1x8xf32>
    %37 = vector.multi_reduction <maximumf>, %36, %cst_14 [2] : vector<1x8x8xf32> to vector<1x8xf32>
    %38 = vector.shape_cast %37 : vector<1x8xf32> to vector<1x8x1xf32>
    %39 = vector.broadcast %38 : vector<1x8x1xf32> to vector<1x8x8xf32>
    %40 = arith.subf %36, %39 : vector<1x8x8xf32>
    %41 = math.exp %40 : vector<1x8x8xf32>
    %cst_15 = arith.constant dense<0.000000e+00> : vector<1x8xf32>
    %42 = vector.multi_reduction <add>, %41, %cst_15 [2] : vector<1x8x8xf32> to vector<1x8xf32>
    %43 = vector.shape_cast %42 : vector<1x8xf32> to vector<1x8x1xf32>
    %44 = tpu.reciprocal %43 {approx = true} : vector<1x8x1xf32> -> vector<1x8x1xf32>
    %45 = vector.broadcast %44 : vector<1x8x1xf32> to vector<1x8x8xf32>
    %46 = arith.mulf %41, %45 : vector<1x8x8xf32>
    %47 = arith.truncf %46 : vector<1x8x8xf32> to vector<1x8x8xbf16>
    "tpu.trace_start"() <{level = 10 : i32, message = "bqk,bkd->bqd"}> : () -> ()
    %cst_16 = arith.constant dense<0.000000e+00> : vector<1x8x16xf32>
    %48 = tpu.matmul %47, %34, %cst_16 {dimension_numbers = #tpu.dot_dimension_numbers<[2], [1], [1], [2], [0, 0, 0, 1, 1, 2], [0], [0]>} : vector<1x8x8xbf16>, vector<1x8x16xbf16>, vector<1x8x16xf32> -> vector<1x8x16xf32>
    "tpu.trace_stop"() : () -> ()
    %49 = vector.shape_cast %48 : vector<1x8x16xf32> to vector<8x16xf32>
    %50 = arith.truncf %49 : vector<8x16xf32> to vector<8x16xbf16>
    %c0_17 = arith.constant 0 : index
    %c0_18 = arith.constant 0 : index
    %51 = vector.load %arg18[%c0_17, %c0_18] : memref<8x32xbf16, #tpu.memory_space<vmem>>, vector<8x16xbf16>
    tpu.vector_store %arg18[%c0_17, %c0_18], %50 {strides = array<i32>} : memref<8x32xbf16, #tpu.memory_space<vmem>>, vector<8x16xbf16>,
    %52 = vector.extract_strided_slice %11 {offsets = [0, 16], sizes = [8, 16], strides = [1, 1]} : vector<8x32xf32> to vector<8x16xf32>
    %53 = vector.extract_strided_slice %52 {offsets = [0, 8], sizes = [8, 8], strides = [1, 1]} : vector<8x16xf32> to vector<8x8xf32>
    %54 = vector.extract_strided_slice %52 {offsets = [0, 0], sizes = [8, 8], strides = [1, 1]} : vector<8x16xf32> to vector<8x8xf32>
    %55 = tpu.concatenate %53, %54 in 1 : vector<8x8xf32>, vector<8x8xf32> -> vector<8x16xf32>
    %56 = arith.mulf %52, %4 : vector<8x16xf32>
    %57 = arith.mulf %55, %5 : vector<8x16xf32>
    %58 = arith.addf %56, %57 : vector<8x16xf32>
    %59 = vector.extract_strided_slice %12 {offsets = [0, 16], sizes = [8, 16], strides = [1, 1]} : vector<8x32xf32> to vector<8x16xf32>
    %60 = vector.extract_strided_slice %59 {offsets = [0, 8], sizes = [8, 8], strides = [1, 1]} : vector<8x16xf32> to vector<8x8xf32>
    %61 = vector.extract_strided_slice %59 {offsets = [0, 0], sizes = [8, 8], strides = [1, 1]} : vector<8x16xf32> to vector<8x8xf32>
    %62 = tpu.concatenate %60, %61 in 1 : vector<8x8xf32>, vector<8x8xf32> -> vector<8x16xf32>
    %63 = arith.mulf %59, %4 : vector<8x16xf32>
    %64 = arith.mulf %62, %5 : vector<8x16xf32>
    %65 = arith.addf %63, %64 : vector<8x16xf32>
    %66 = vector.shape_cast %58 : vector<8x16xf32> to vector<1x8x16xf32>
    %67 = arith.truncf %66 : vector<1x8x16xf32> to vector<1x8x16xbf16>
    %68 = vector.shape_cast %65 : vector<8x16xf32> to vector<1x8x16xf32>
    %69 = arith.truncf %68 : vector<1x8x16xf32> to vector<1x8x16xbf16>
    %70 = vector.extract_strided_slice %13 {offsets = [0, 16], sizes = [8, 16], strides = [1, 1]} : vector<8x32xf32> to vector<8x16xf32>
    %71 = vector.shape_cast %70 : vector<8x16xf32> to vector<1x8x16xf32>
    %72 = arith.truncf %71 : vector<1x8x16xf32> to vector<1x8x16xbf16>
    "tpu.trace_start"() <{level = 10 : i32, message = "bqd,bkd->bqk"}> : () -> ()
    %cst_19 = arith.constant dense<0.000000e+00> : vector<1x8x8xf32>
    %73 = tpu.matmul %67, %69, %cst_19 {dimension_numbers = #tpu.dot_dimension_numbers<[2], [2], [1], [1], [0, 0, 0, 1, 1, 1], [0], [0]>} : vector<1x8x16xbf16>, vector<1x8x16xbf16>, vector<1x8x8xf32> -> vector<1x8x8xf32>
    "tpu.trace_stop"() : () -> ()
    %74 = arith.addf %73, %3 : vector<1x8x8xf32>
    %cst_20 = arith.constant dense<0xFF800000> : vector<1x8xf32>
    %75 = vector.multi_reduction <maximumf>, %74, %cst_20 [2] : vector<1x8x8xf32> to vector<1x8xf32>
    %76 = vector.shape_cast %75 : vector<1x8xf32> to vector<1x8x1xf32>
    %77 = vector.broadcast %76 : vector<1x8x1xf32> to vector<1x8x8xf32>
    %78 = arith.subf %74, %77 : vector<1x8x8xf32>
    %79 = math.exp %78 : vector<1x8x8xf32>
    %cst_21 = arith.constant dense<0.000000e+00> : vector<1x8xf32>
    %80 = vector.multi_reduction <add>, %79, %cst_21 [2] : vector<1x8x8xf32> to vector<1x8xf32>
    %81 = vector.shape_cast %80 : vector<1x8xf32> to vector<1x8x1xf32>
    %82 = tpu.reciprocal %81 {approx = true} : vector<1x8x1xf32> -> vector<1x8x1xf32>
    %83 = vector.broadcast %82 : vector<1x8x1xf32> to vector<1x8x8xf32>
    %84 = arith.mulf %79, %83 : vector<1x8x8xf32>
    %85 = arith.truncf %84 : vector<1x8x8xf32> to vector<1x8x8xbf16>
    "tpu.trace_start"() <{level = 10 : i32, message = "bqk,bkd->bqd"}> : () -> ()
    %cst_22 = arith.constant dense<0.000000e+00> : vector<1x8x16xf32>
    %86 = tpu.matmul %85, %72, %cst_22 {dimension_numbers = #tpu.dot_dimension_numbers<[2], [1], [1], [2], [0, 0, 0, 1, 1, 2], [0], [0]>} : vector<1x8x8xbf16>, vector<1x8x16xbf16>, vector<1x8x16xf32> -> vector<1x8x16xf32>
    "tpu.trace_stop"() : () -> ()
    %87 = vector.shape_cast %86 : vector<1x8x16xf32> to vector<8x16xf32>
    %88 = arith.truncf %87 : vector<8x16xf32> to vector<8x16xbf16>
    %c0_23 = arith.constant 0 : index
    %c16 = arith.constant 16 : index
    %89 = vector.load %arg18[%c0_23, %c16] : memref<8x32xbf16, #tpu.memory_space<vmem>>, vector<8x16xbf16>
    tpu.vector_store %arg18[%c0_23, %c16], %88 {strides = array<i32>} : memref<8x32xbf16, #tpu.memory_space<vmem>>, vector<8x16xbf16>,
    %c0_24 = arith.constant 0 : index
    %c0_25 = arith.constant 0 : index
    %90 = vector.load %arg18[%c0_24, %c0_25] : memref<8x32xbf16, #tpu.memory_space<vmem>>, vector<8x32xbf16>
    %c0_26 = arith.constant 0 : index
    %c0_27 = arith.constant 0 : index
    %91 = vector.load %arg7[%c0_26, %c0_27] : memref<32x32xbf16, #tpu.memory_space<vmem>>, vector<32x32xbf16>
    %cst_28 = arith.constant dense<0.000000e+00> : vector<8x32xf32>
    %92 = tpu.matmul %90, %91, %cst_28 {dimension_numbers = #tpu.dot_dimension_numbers<[1], [0], [0], [1], [0, 0, 1, 1], [], []>} : vector<8x32xbf16>, vector<32x32xbf16>, vector<8x32xf32> -> vector<8x32xf32>
    %c0_29 = arith.constant 0 : index
    %c0_30 = arith.constant 0 : index
    %93 = vector.load %arg8[%c0_29, %c0_30] : memref<1x32xf32, #tpu.memory_space<vmem>>, vector<1x32xf32>
    %94 = vector.broadcast %93 : vector<1x32xf32> to vector<8x32xf32>
    %95 = arith.addf %92, %94 : vector<8x32xf32>
    %96 = arith.addf %95, %2 : vector<8x32xf32>
    %c0_31 = arith.constant 0 : index
    %c0_32 = arith.constant 0 : index
    %97 = vector.load %arg9[%c0_31, %c0_32] : memref<1x32xf32, #tpu.memory_space<vmem>>, vector<1x32xf32>
    %c0_33 = arith.constant 0 : index
    %c0_34 = arith.constant 0 : index
    %98 = vector.load %arg10[%c0_33, %c0_34] : memref<1x32xf32, #tpu.memory_space<vmem>>, vector<1x32xf32>
    %cst_35 = arith.constant dense<0.000000e+00> : vector<8xf32>
    %99 = vector.multi_reduction <add>, %96, %cst_35 [1] : vector<8x32xf32> to vector<8xf32>
    %100 = vector.shape_cast %99 : vector<8xf32> to vector<8x1xf32>
    %cst_36 = arith.constant 3.200000e+01 : f32
    %101 = vector.broadcast %cst_36 : f32 to vector<8x1xf32>
    %102 = arith.divf %100, %101 : vector<8x1xf32>
    %103 = vector.broadcast %102 : vector<8x1xf32> to vector<8x32xf32>
    %104 = arith.subf %96, %103 : vector<8x32xf32>
    %105 = arith.mulf %104, %104 : vector<8x32xf32>
    %cst_37 = arith.constant dense<0.000000e+00> : vector<8xf32>
    %106 = vector.multi_reduction <add>, %105, %cst_37 [1] : vector<8x32xf32> to vector<8xf32>
    %107 = vector.shape_cast %106 : vector<8xf32> to vector<8x1xf32>
    %cst_38 = arith.constant 3.200000e+01 : f32
    %108 = vector.broadcast %cst_38 : f32 to vector<8x1xf32>
    %109 = arith.divf %107, %108 : vector<8x1xf32>
    %cst_39 = arith.constant 9.99999996E-13 : f32
    %110 = vector.broadcast %cst_39 : f32 to vector<8x1xf32>
    %111 = arith.addf %109, %110 : vector<8x1xf32>
    %112 = math.rsqrt %111 : vector<8x1xf32>
    %113 = vector.broadcast %112 : vector<8x1xf32> to vector<8x32xf32>
    %114 = arith.mulf %104, %113 : vector<8x32xf32>
    %115 = vector.broadcast %97 : vector<1x32xf32> to vector<8x32xf32>
    %116 = arith.mulf %114, %115 : vector<8x32xf32>
    %117 = vector.broadcast %98 : vector<1x32xf32> to vector<8x32xf32>
    %118 = arith.addf %116, %117 : vector<8x32xf32>
    %119 = arith.truncf %118 : vector<8x32xf32> to vector<8x32xbf16>
    %c0_40 = arith.constant 0 : index
    %c0_41 = arith.constant 0 : index
    %120 = vector.load %arg11[%c0_40, %c0_41] : memref<32x64xbf16, #tpu.memory_space<vmem>>, vector<32x64xbf16>
    %cst_42 = arith.constant dense<0.000000e+00> : vector<8x64xf32>
    %121 = tpu.matmul %119, %120, %cst_42 {dimension_numbers = #tpu.dot_dimension_numbers<[1], [0], [0], [1], [0, 0, 1, 1], [], []>} : vector<8x32xbf16>, vector<32x64xbf16>, vector<8x64xf32> -> vector<8x64xf32>
    %c0_43 = arith.constant 0 : index
    %c0_44 = arith.constant 0 : index
    %122 = vector.load %arg12[%c0_43, %c0_44] : memref<1x64xf32, #tpu.memory_space<vmem>>, vector<1x64xf32>
    %123 = vector.broadcast %122 : vector<1x64xf32> to vector<8x64xf32>
    %124 = arith.addf %121, %123 : vector<8x64xf32>
    %cst_45 = arith.constant 5.000000e-01 : f32
    %125 = vector.broadcast %cst_45 : f32 to vector<8x64xf32>
    %126 = arith.mulf %124, %125 : vector<8x64xf32>
    %cst_46 = arith.constant 0.707106769 : f32
    %127 = vector.broadcast %cst_46 : f32 to vector<8x64xf32>
    %128 = arith.mulf %124, %127 : vector<8x64xf32>
    %129 = math.absf %128 : vector<8x64xf32>
    %cst_47 = arith.constant 0.327591091 : f32
    %130 = vector.broadcast %cst_47 : f32 to vector<8x64xf32>
    %131 = arith.mulf %130, %129 : vector<8x64xf32>
    %cst_48 = arith.constant 1.000000e+00 : f32
    %132 = vector.broadcast %cst_48 : f32 to vector<8x64xf32>
    %133 = arith.addf %132, %131 : vector<8x64xf32>
    %cst_49 = arith.constant 1.000000e+00 : f32
    %134 = vector.broadcast %cst_49 : f32 to vector<8x64xf32>
    %135 = arith.divf %134, %133 : vector<8x64xf32>
    %cst_50 = arith.constant 1.06140542 : f32
    %136 = vector.broadcast %cst_50 : f32 to vector<8x64xf32>
    %137 = arith.mulf %136, %135 : vector<8x64xf32>
    %cst_51 = arith.constant -1.45315206 : f32
    %138 = vector.broadcast %cst_51 : f32 to vector<8x64xf32>
    %139 = arith.addf %137, %138 : vector<8x64xf32>
    %140 = arith.mulf %139, %135 : vector<8x64xf32>
    %cst_52 = arith.constant 1.42141378 : f32
    %141 = vector.broadcast %cst_52 : f32 to vector<8x64xf32>
    %142 = arith.addf %140, %141 : vector<8x64xf32>
    %143 = arith.mulf %142, %135 : vector<8x64xf32>
    %cst_53 = arith.constant -0.284496725 : f32
    %144 = vector.broadcast %cst_53 : f32 to vector<8x64xf32>
    %145 = arith.addf %143, %144 : vector<8x64xf32>
    %146 = arith.mulf %145, %135 : vector<8x64xf32>
    %cst_54 = arith.constant 0.254829586 : f32
    %147 = vector.broadcast %cst_54 : f32 to vector<8x64xf32>
    %148 = arith.addf %146, %147 : vector<8x64xf32>
    %149 = arith.mulf %148, %135 : vector<8x64xf32>
    %cst_55 = arith.constant 0.000000e+00 : f32
    %150 = vector.broadcast %cst_55 : f32 to vector<8x64xf32>
    %151 = arith.subf %150, %129 : vector<8x64xf32>
    %152 = arith.mulf %151, %129 : vector<8x64xf32>
    %153 = math.exp %152 : vector<8x64xf32>
    %154 = arith.mulf %149, %153 : vector<8x64xf32>
    %cst_56 = arith.constant 1.000000e+00 : f32
    %155 = vector.broadcast %cst_56 : f32 to vector<8x64xf32>
    %156 = arith.subf %155, %154 : vector<8x64xf32>
    %cst_57 = arith.constant 0.000000e+00 : f32
    %157 = vector.broadcast %cst_57 : f32 to vector<8x64xf32>
    %158 = arith.cmpf olt, %128, %157 : vector<8x64xf32>
    %cst_58 = arith.constant 0.000000e+00 : f32
    %159 = vector.broadcast %cst_58 : f32 to vector<8x64xf32>
    %160 = arith.subf %159, %156 : vector<8x64xf32>
    %161 = arith.select %158, %160, %156 : vector<8x64xi1>, vector<8x64xf32>
    %cst_59 = arith.constant 1.000000e+00 : f32
    %162 = vector.broadcast %cst_59 : f32 to vector<8x64xf32>
    %163 = arith.addf %162, %161 : vector<8x64xf32>
    %164 = arith.mulf %126, %163 : vector<8x64xf32>
    %165 = arith.truncf %164 : vector<8x64xf32> to vector<8x64xbf16>
    %c0_60 = arith.constant 0 : index
    %c0_61 = arith.constant 0 : index
    %166 = vector.load %arg13[%c0_60, %c0_61] : memref<64x32xbf16, #tpu.memory_space<vmem>>, vector<64x32xbf16>
    %cst_62 = arith.constant dense<0.000000e+00> : vector<8x32xf32>
    %167 = tpu.matmul %165, %166, %cst_62 {dimension_numbers = #tpu.dot_dimension_numbers<[1], [0], [0], [1], [0, 0, 1, 1], [], []>} : vector<8x64xbf16>, vector<64x32xbf16>, vector<8x32xf32> -> vector<8x32xf32>
    %c0_63 = arith.constant 0 : index
    %c0_64 = arith.constant 0 : index
    %168 = vector.load %arg14[%c0_63, %c0_64] : memref<1x32xf32, #tpu.memory_space<vmem>>, vector<1x32xf32>
    %169 = vector.broadcast %168 : vector<1x32xf32> to vector<8x32xf32>
    %170 = arith.addf %167, %169 : vector<8x32xf32>
    %171 = arith.addf %170, %118 : vector<8x32xf32>
    %c0_65 = arith.constant 0 : index
    %c0_66 = arith.constant 0 : index
    %172 = vector.load %arg15[%c0_65, %c0_66] : memref<1x32xf32, #tpu.memory_space<vmem>>, vector<1x32xf32>
    %c0_67 = arith.constant 0 : index
    %c0_68 = arith.constant 0 : index
    %173 = vector.load %arg16[%c0_67, %c0_68] : memref<1x32xf32, #tpu.memory_space<vmem>>, vector<1x32xf32>
    %cst_69 = arith.constant dense<0.000000e+00> : vector<8xf32>
    %174 = vector.multi_reduction <add>, %171, %cst_69 [1] : vector<8x32xf32> to vector<8xf32>
    %175 = vector.shape_cast %174 : vector<8xf32> to vector<8x1xf32>
    %cst_70 = arith.constant 3.200000e+01 : f32
    %176 = vector.broadcast %cst_70 : f32 to vector<8x1xf32>
    %177 = arith.divf %175, %176 : vector<8x1xf32>
    %178 = vector.broadcast %177 : vector<8x1xf32> to vector<8x32xf32>
    %179 = arith.subf %171, %178 : vector<8x32xf32>
    %180 = arith.mulf %179, %179 : vector<8x32xf32>
    %cst_71 = arith.constant dense<0.000000e+00> : vector<8xf32>
    %181 = vector.multi_reduction <add>, %180, %cst_71 [1] : vector<8x32xf32> to vector<8xf32>
    %182 = vector.shape_cast %181 : vector<8xf32> to vector<8x1xf32>
    %cst_72 = arith.constant 3.200000e+01 : f32
    %183 = vector.broadcast %cst_72 : f32 to vector<8x1xf32>
    %184 = arith.divf %182, %183 : vector<8x1xf32>
    %cst_73 = arith.constant 9.99999996E-13 : f32
    %185 = vector.broadcast %cst_73 : f32 to vector<8x1xf32>
    %186 = arith.addf %184, %185 : vector<8x1xf32>
    %187 = math.rsqrt %186 : vector<8x1xf32>
    %188 = vector.broadcast %187 : vector<8x1xf32> to vector<8x32xf32>
    %189 = arith.mulf %179, %188 : vector<8x32xf32>
    %190 = vector.broadcast %172 : vector<1x32xf32> to vector<8x32xf32>
    %191 = arith.mulf %189, %190 : vector<8x32xf32>
    %192 = vector.broadcast %173 : vector<1x32xf32> to vector<8x32xf32>
    %193 = arith.addf %191, %192 : vector<8x32xf32>
    %194 = vector.shape_cast %193 : vector<8x32xf32> to vector<1x8x32xf32>
    %195 = arith.truncf %194 : vector<1x8x32xf32> to vector<1x8x32xbf16>
    %c0_74 = arith.constant 0 : index
    %c0_75 = arith.constant 0 : index
    %c0_76 = arith.constant 0 : index
    %196 = vector.load %arg17[%c0_74, %c0_75, %c0_76] : memref<1x8x32xbf16, #tpu.memory_space<vmem>>, vector<1x8x32xbf16>
    tpu.vector_store %arg17[%c0_74, %c0_75, %c0_76], %195 {strides = array<i32>} : memref<1x8x32xbf16, #tpu.memory_space<vmem>>, vector<1x8x32xbf16>,
    return
  }
  func.func @transform_0(%arg0: i32) -> (i32, i32, i32) {
    %c0_i32 = arith.constant 0 : i32
    %c0_i32_0 = arith.constant 0 : i32
    %c0_i32_1 = arith.constant 0 : i32
    return %arg0, %c0_i32, %c0_i32_0 : i32, i32, i32
  }
  func.func @transform_1(%arg0: i32) -> (i32, i32, i32) {
    %c0_i32 = arith.constant 0 : i32
    %c0_i32_0 = arith.constant 0 : i32
    %c0_i32_1 = arith.constant 0 : i32
    %c0_i32_2 = arith.constant 0 : i32
    return %c0_i32, %c0_i32_0, %c0_i32_1 : i32, i32, i32
  }
  func.func @transform_2(%arg0: i32) -> (i32, i32) {
    %c0_i32 = arith.constant 0 : i32
    %c0_i32_0 = arith.constant 0 : i32
    %c0_i32_1 = arith.constant 0 : i32
    return %c0_i32, %c0_i32_0 : i32, i32
  }
  func.func @transform_3(%arg0: i32) -> (i32, i32) {
    %c0_i32 = arith.constant 0 : i32
    %c0_i32_0 = arith.constant 0 : i32
    %c0_i32_1 = arith.constant 0 : i32
    return %c0_i32, %c0_i32_0 : i32, i32
  }
  func.func @transform_4(%arg0: i32) -> (i32, i32) {
    %c0_i32 = arith.constant 0 : i32
    %c0_i32_0 = arith.constant 0 : i32
    %c0_i32_1 = arith.constant 0 : i32
    return %c0_i32, %c0_i32_0 : i32, i32
  }
  func.func @transform_5(%arg0: i32) -> (i32, i32) {
    %c0_i32 = arith.constant 0 : i32
    %c0_i32_0 = arith.constant 0 : i32
    %c0_i32_1 = arith.constant 0 : i32
    return %c0_i32, %c0_i32_0 : i32, i32
  }
  func.func @transform_6(%arg0: i32) -> (i32, i32) {
    %c0_i32 = arith.constant 0 : i32
    %c0_i32_0 = arith.constant 0 : i32
    %c0_i32_1 = arith.constant 0 : i32
    return %c0_i32, %c0_i32_0 : i32, i32
  }
  func.func @transform_7(%arg0: i32) -> (i32, i32) {
    %c0_i32 = arith.constant 0 : i32
    %c0_i32_0 = arith.constant 0 : i32
    %c0_i32_1 = arith.constant 0 : i32
    return %c0_i32, %c0_i32_0 : i32, i32
  }
  func.func @transform_8(%arg0: i32) -> (i32, i32) {
    %c0_i32 = arith.constant 0 : i32
    %c0_i32_0 = arith.constant 0 : i32
    %c0_i32_1 = arith.constant 0 : i32
    return %c0_i32, %c0_i32_0 : i32, i32
  }
  func.func @transform_9(%arg0: i32) -> (i32, i32) {
    %c0_i32 = arith.constant 0 : i32
    %c0_i32_0 = arith.constant 0 : i32
    %c0_i32_1 = arith.constant 0 : i32
    return %c0_i32, %c0_i32_0 : i32, i32
  }
  func.func @transform_10(%arg0: i32) -> (i32, i32) {
    %c0_i32 = arith.constant 0 : i32
    %c0_i32_0 = arith.constant 0 : i32
    %c0_i32_1 = arith.constant 0 : i32
    return %c0_i32, %c0_i32_0 : i32, i32
  }
  func.func @transform_11(%arg0: i32) -> (i32, i32) {
    %c0_i32 = arith.constant 0 : i32
    %c0_i32_0 = arith.constant 0 : i32
    %c0_i32_1 = arith.constant 0 : i32
    return %c0_i32, %c0_i32_0 : i32, i32
  }
  func.func @transform_12(%arg0: i32) -> (i32, i32) {
    %c0_i32 = arith.constant 0 : i32
    %c0_i32_0 = arith.constant 0 : i32
    %c0_i32_1 = arith.constant 0 : i32
    return %c0_i32, %c0_i32_0 : i32, i32
  }
  func.func @transform_13(%arg0: i32) -> (i32, i32) {
    %c0_i32 = arith.constant 0 : i32
    %c0_i32_0 = arith.constant 0 : i32
    %c0_i32_1 = arith.constant 0 : i32
    return %c0_i32, %c0_i32_0 : i32, i32
  }
  func.func @transform_14(%arg0: i32) -> (i32, i32) {
    %c0_i32 = arith.constant 0 : i32
    %c0_i32_0 = arith.constant 0 : i32
    %c0_i32_1 = arith.constant 0 : i32
    return %c0_i32, %c0_i32_0 : i32, i32
  }
  func.func @transform_15(%arg0: i32) -> (i32, i32) {
    %c0_i32 = arith.constant 0 : i32
    %c0_i32_0 = arith.constant 0 : i32
    %c0_i32_1 = arith.constant 0 : i32
    return %c0_i32, %c0_i32_0 : i32, i32
  }
  func.func @transform_16(%arg0: i32) -> (i32, i32, i32) {
    %c0_i32 = arith.constant 0 : i32
    %c0_i32_0 = arith.constant 0 : i32
    %c0_i32_1 = arith.constant 0 : i32
    return %arg0, %c0_i32, %c0_i32_0 : i32, i32, i32
  }
}

</mosaic_0001>

<bundles_post_ra>
// kernel: tpu_custom_call.1
= control target key start
LH: loop header
LB: loop body
LE: loop exit
PB: predicated region body
PF: predicated region fallthrough
CT: control target
= control target key end

     0   :  { %s2213_s0 = inlined_call_operand.hbm [shape: bf16[2,8,32], index: 0, kind: input, shape index: {}]   ;;  %s2214_s1 = inlined_call_operand.hbm [shape: f32[1,8,8], index: 1, kind: input, shape index: {}]   ;;  %s2215_s2 = inlined_call_operand.hbm [shape: f32[8,16], index: 2, kind: input, shape index: {}]   ;;  %s2216_s3 = inlined_call_operand.hbm [shape: f32[8,16], index: 3, kind: input, shape index: {}]   ;;  %s2217_s4 = inlined_call_operand.vmem [shape: bf16[32,96], index: 4, kind: input, shape index: {}]   ;;  %s2218_s5 = inlined_call_operand.vmem [shape: f32[1,96], index: 5, kind: input, shape index: {}]   ;;  %s2219_s6 = inlined_call_operand.vmem [shape: bf16[32,32], index: 6, kind: input, shape index: {}]   ;;  %s2220_s7 = inlined_call_operand.vmem [shape: f32[1,32], index: 7, kind: input, shape index: {}]   ;;  %s2221_s8 = inlined_call_operand.vmem [shape: f32[1,32], index: 8, kind: input, shape index: {}]   ;;  %s2222_s9 = inlined_call_operand.vmem [shape: f32[1,32], index: 9, kind: input, shape index: {}]   ;;  %s2223_s10 = inlined_call_operand.vmem [shape: bf16[32,64], index: 10, kind: input, shape index: {}]   ;;  %s2224_s11 = inlined_call_operand.vmem [shape: f32[1,64], index: 11, kind: input, shape index: {}]   ;;  %s2225_s12 = inlined_call_operand.vmem [shape: bf16[64,32], index: 12, kind: input, shape index: {}]   ;;  %s2226_s13 = inlined_call_operand.vmem [shape: f32[1,32], index: 13, kind: input, shape index: {}]   ;;  %s2227_s14 = inlined_call_operand.vmem [shape: f32[1,32], index: 14, kind: input, shape index: {}]   ;;  %s2228_s15 = inlined_call_operand.vmem [shape: f32[1,32], index: 15, kind: input, shape index: {}]   ;;  %s2229_s16 = inlined_call_operand.hbm [shape: bf16[2,8,32], index: 16, kind: output, shape index: {}]  }
   0x1   :  { %2242 = sst [smem:[#allocation22_spill]] %s2213_s0 }
   0x2   :  { %2243 = sst [smem:[#allocation23_spill]] %s2214_s1 }
   0x3   :  { %2244 = sst [smem:[#allocation24_spill]] %s2215_s2 }
   0x4   :  { %2245 = sst [smem:[#allocation25_spill]] %s2216_s3 }
   0x5   :  { %2246 = sst [smem:[#allocation26_spill]] %s2228_s15 }
   0x6   :  { %2247 = sst [smem:[#allocation27_spill]] %s2229_s16 }
   0x7   :  { %21 = vsyncpa [#allocation4], 0 }
   0x8   :  { %23 = vsyncpa [#allocation4 + $0x1], 0 }
   0x9   :  { %24 = vsyncpa [#allocation7], 0 }
   0xa   :  { %25 = vsyncpa [#allocation10], 0 }
   0xb   :  { %26 = vsyncpa [#allocation5], 0 }
   0xc   :  { %28 = vsyncpa [#allocation5 + $0x1], 0  ;;  %s1895_s21 = smov 0   ;;  %s1897_s22 = smov 0  }
   0xd   :  { %s1899_s23 = smov 0   ;;  %s1901_s24 = smov 0  }
   0xe LB: > { %2248 = sst [smem:[#allocation16_spill]] %s1777_s21  ;;  %s1916_s25 = sadd.s32 4294967295, %s1789_s24   ;;  %s1789_s24 = sphi %s1901_s24, %s2279_s24   ;;  %s1785_s23 = sphi %s1899_s23, %s2281_s23   ;;  %s1781_s22 = sphi %s1897_s22, %s2283_s22   ;;  %s1777_s21 = sphi %s1895_s21, %s2282_s21  }
   0xf   : > { %2249 = sst [smem:[#allocation17_spill]] %s1785_s23  ;;  %s1366_s26 = sadd.s32 4294967294, %s1789_s24  }
  0x10   : > { %2250 = sst [smem:[#allocation18_spill]] %s1789_s24  ;;  %p54_p0 = scmp.ne.s32.totalorder %s1781_s22, %s1777_s21 }
  0x11   : > { %p2232_p1 = scmp.eq.s32.totalorder %s1916_s25, 0  ;;  %p399_p3 = scmp.eq.s32.totalorder %s1366_s26, 1 }
  0x12   : > { %p1367_p5 = scmp.ge.s32.totalorder %s1789_s24, 1  ;;  %p406_p7 = scmp.lt.s32.totalorder %s1789_s24, 3 }
  0x13   : > { %p1925_p4 = por %p2232_p1, %p54_p0  ;;  %p1930_p6 = por %p399_p3, %p54_p0 }
  0x14   : > { %p1935_p8 = pnand %p1367_p5, %p406_p7  ;;  %s1791_s30 = smov [#allocation6]  }
  0x15   : > { %s2251_s27 = scalar_select %p1925_p4, 1, 0 }
  0x16   : > { %s2252_s28 = scalar_select %p1930_p6, 1, 0 }
  0x17   : > { %s2254_s29 = scalar_select %p1935_p8, 1, 0 }
  0x18   : > { %2253 = sst [smem:[#allocation19_spill]] %s2252_s28  ;;  %s419_s0 = sshll.u32 %s1791_s30, 4  ;;  %s420_s0 = int_to_ptr.vmem [resolvable:$true] %s419_s0 }
  0x19   : > { %p1510_p10 = pneg %p1935_p8  ;;  %s1792_s17 = smov [#allocation8]  }
  0x1a   : > { %s430_s18 = sshll.u32 %s1792_s17, 4  ;;  %s1793_s20 = smov [#allocation9]   ;;  %s431_s18 = int_to_ptr.vmem [resolvable:$true] %s430_s18 }
  0x1b   : > { %p1944_p11 = pnand %p1510_p10, %p2232_p1  ;;  %s441_s26 = sshll.u32 %s1793_s20, 4  ;;  %s1948_s26 = int_to_ptr.vmem [resolvable:$true] %s441_s26 }
  0x1c   : > { %s1622_s30 = scalar_lea.vmem %s420_s0, 128  ;;  %p1630_p5 = scmp.lt.s32.totalorder %s420_s0, %s420_s0 }
  0x1d   : > { %p1613_p12 = pneg %p1944_p11  ;;  %p1623_p13 = scmp.ne.s32.totalorder %s420_s0, %s1622_s30 }
  0x1e   : > { %p1631_p7 = scmp.lt.s32.totalorder %s1622_s30, %s1622_s30 }
  0x1f   : > { %p1625_p0 = pnand %p1623_p13, %p1613_p12 }
  0x20   : > { %p1632_p10 = por %p1631_p7, %p1630_p5 }
  0x21   : > { %p1626_p3 = pneg %p1625_p0 }
  0x23   : > { %p1633_p9 = pnand %p1632_p10, %p1626_p3 }
  0x25   : > { %1636 = shalt.err (!%p1633_p9)
}
  0x26   : > { %s2256_s1 = sld [smem:[#allocation23_spill]]  ;;  %s1648_s20 = scalar_lea.vmem %s431_s18, 128 }
  0x27   : > { %p1649_p1 = scmp.ne.s32.totalorder %s431_s18, %s1648_s20  ;;  %p1656_p13 = scmp.lt.s32.totalorder %s431_s18, %s431_s18 }
  0x28   : > { %p1657_p0 = scmp.lt.s32.totalorder %s1648_s20, %s1648_s20 }
  0x29   : > { %p1651_p2 = pnand %p1649_p1, %p1613_p12 }
  0x2a   : > { %p1658_p4 = por %p1657_p0, %p1656_p13 }
  0x2b   : > { %p1652_p6 = pneg %p1651_p2 }
  0x2c   : > { %1513 = dma.hbm_to_vmem [thread:$0]  (!%p1944_p11), %s2256_s1, 128, %s420_s0, [#allocation7]  }
  0x2d   : > { %p1659_p8 = pnand %p1658_p4, %p1652_p6 }
  0x2f   : > { %1662 = shalt.err (!%p1659_p8)
}
  0x30   : > { %s2257_s2 = sld [smem:[#allocation24_spill]]  ;;  %s1674_s28 = scalar_lea.vmem %s1948_s26, 128 }
  0x31   : > { %p1675_p9 = scmp.ne.s32.totalorder %s1948_s26, %s1674_s28  ;;  %p1682_p3 = scmp.lt.s32.totalorder %s1948_s26, %s1948_s26 }
  0x32   : > { %p1683_p4 = scmp.lt.s32.totalorder %s1674_s28, %s1674_s28 }
  0x33   : > { %p1677_p1 = pnand %p1675_p9, %p1613_p12 }
  0x34   : > { %p1684_p6 = por %p1683_p4, %p1682_p3 }
  0x35   : > { %p1678_p2 = pneg %p1677_p1 }
  0x36   : > { %1516 = dma.hbm_to_vmem [thread:$0]  (!%p1944_p11), %s2257_s2, 128, %s431_s18, [#allocation7]  }
  0x37   : > { %p1685_p8 = pnand %p1684_p6, %p1678_p2 }
  0x39   : > { %1688 = shalt.err (!%p1685_p8)
}
  0x3a   : > { %s2258_s3 = sld [smem:[#allocation25_spill]]  ;;  %s1982_s18 = sadd.s32 1, %s1789_s24  }
  0x3b   : > { %2259 = sst [smem:[#allocation20_spill]] %s1982_s18  ;;  %s38_s19 = ssub.s32 %s1789_s24, %s1982_s18 }
  0x3c   : > { %s41_s17 = sadd.s32 1, %s1785_s23  ;;  %p39_p12 = scmp.eq.s32.totalorder %s38_s19, 0 }
  0x3d   : > { %p48_p5 = scmp.ne.s32.totalorder %s1785_s23, %s1781_s22  ;;  %p49_p7 = scmp.eq.s32.totalorder %s1789_s24, 0 }
  0x3e   : > { %p1531_p10 = scmp.lt.s32.totalorder %s1789_s24, 2  ;;  %p2261_p0 = scmp.eq.s32.totalorder %s1916_s25, 1 }
  0x3f   : > { %s1992_s20 = scalar_select %p39_p12, %s1785_s23, %s41_s17  }
  0x40   : > { %1519 = dma.hbm_to_vmem [thread:$0]  (!%p1944_p11), %s2258_s3, 128, %s1948_s26, [#allocation10]  }
  0x41   : > { %2260 = sst [smem:[#allocation21_spill]] %s1992_s20  ;;  %p50_p13 = por %p49_p7, %p48_p5 }
  0x42   : > { %p1996_p9 = por %p2261_p0, %p48_p5  ;;  %s488_s28 = sand.u32 1, %s1785_s23  }
  0x43   : > { %s1373_s21 = sshll.u32 %s1789_s24, 6  ;;  %s1372_s26 = sshll.u32 %s488_s28, 2 }
  0x44   : > { %s2262_s30 = scalar_select %p1996_p9, 1, 0 }
  0x45   : > { %s2263_s2 = sld [smem:[#allocation22_spill]]  ;;  %s492_s19 = scalar_lea.vmem [#allocation3], %s1372_s26 }
  0x46   : > { %s499_s17 = sshll.u32 %s492_s19, 4  ;;  %p2007_p11 = pnand %p1531_p10, %p50_p13  ;;  %s500_s17 = int_to_ptr.vmem [resolvable:$true] %s499_s17 }
  0x47   : > { %s489_s18 = scalar_lea.sflag [#allocation4], %s488_s28 }
  0x48   : > { %p1691_p2 = pneg %p2007_p11 }
  0x4b   : > { %s2005_s3 = scalar_lea.hbm %s2263_s2, %s1373_s21  ;;  %s1694_s0 = scalar_lea.hbm %s2263_s2, 128 }
  0x4c   : > { %s1689_s23 = scalar_lea.hbm %s2005_s3, 64  ;;  %p1695_p6 = scmp.lt.s32.totalorder %s2005_s3, %s2263_s2 }
  0x4d   : > { %p1690_p1 = scmp.ne.s32.totalorder %s2005_s3, %s1689_s23  ;;  %p1696_p8 = scmp.lt.s32.totalorder %s1694_s0, %s1689_s23 }
  0x4f   : > { %p1692_p3 = pnand %p1691_p2, %p1690_p1  ;;  %p1697_p12 = por %p1696_p8, %p1695_p6 }
  0x51   : > { %p1693_p4 = pneg %p1692_p3 }
  0x53   : > { %p1698_p5 = pnand %p1697_p12, %p1693_p4 }
  0x55   : > { %1701 = shalt.err (!%p1698_p5)
}
  0x56   : > { %s1702_s19 = scalar_lea.vmem %s500_s17, 64  ;;  %s1794_s28 = smov [#allocation3]  }
  0x57   : > { %p1703_p7 = scmp.ne.s32.totalorder %s500_s17, %s1702_s19  ;;  %s1707_s16 = sshll.u32 %s1794_s28, 4  ;;  %s1708_s16 = int_to_ptr.vmem [resolvable:$false] %s1707_s16 }
  0x58   : > { %s1709_s15 = scalar_lea.vmem %s1708_s16, 128  ;;  %p1710_p0 = scmp.lt.s32.totalorder %s500_s17, %s1708_s16 }
  0x59   : > { %p1705_p10 = pnand %p1703_p7, %p1691_p2  ;;  %p1711_p1 = scmp.lt.s32.totalorder %s1709_s15, %s1702_s19 }
  0x5b   : > { %p1706_p13 = pneg %p1705_p10  ;;  %p1712_p3 = por %p1711_p1, %p1710_p0 }
  0x5d   : > { %p1713_p9 = pnand %p1712_p3, %p1706_p13 }
  0x5f   : > { %1716 = shalt.err (!%p1713_p9)
}
  0x60   : > { %1523 = dma.hbm_to_vmem [thread:$0]  (!%p2007_p11), %s2005_s3, 64, %s500_s17, %s489_s18  }
  0x61   : > { %p2265_p4 = scmp.ne.s32.totalorder %s2254_s29, 0 }
  0x62   : > { %s2028_s23 = sand.u32 (!%p2265_p4), 1, %s1781_s22   ;;  %p2266_p2 = scmp.ne.s32.totalorder (!%p2265_p4), %s2251_s27, 0 }
  0x63   : > { %508 = sbr.rel (%p2265_p4) target bundleno = 2790 (0xae6), region = 84  ;;  %s1375_s24 = sshll.u32 (!%p2265_p4), %s2028_s23, 2 }
  0x64   : > { %s511_s16 = scalar_lea.sflag (!%p2265_p4), [#allocation4], %s2028_s23  ;;  %s514_s15 = scalar_lea.vmem (!%p2265_p4), [#allocation3], %s1375_s24 }
  0x68   : > { %1760 = dma.done.wait (%p2266_p2), %s511_s16, 64  }
  0x69   : > { %1762 = vsyncadd (%p2266_p2), %s511_s16, 4294967232  ;;  %p2267_p9 = scmp.eq.s32.totalorder %s1916_s25, 0 }
  0x6b   : > { %1764 = dma.done.wait (%p2267_p9), [#allocation7], 256   ;;  %p2268_p11 = pmov %p2267_p9 }
  0x6c   : > { %p2269_p6 = pmov %p2267_p9 }
  0x6d   : > { %1766 = vsyncadd (%p2268_p11), [#allocation7], 4294967040 }
  0x6e   : > { %1768 = dma.done.wait (%p2269_p6), [#allocation10], 128   ;;  %p2270_p8 = pmov %p2269_p6 }
  0x6f   : > { %v1795_v0 = vmov 0.0   ;;  %vm1796_vm0 = vmmov 0   ;;  %v1585_v1 = vld [vmem:[%s2217_s4 + $0x8] sm:$0xff]   ;;  %v1586_v2 = vld [vmem:[%s2217_s4] sm:$0xff]   ;;  %vm604_vm1 = vcmask 261120   ;;  %s1797_s1 = smov 72  }
  0x70   : > { %1770 = vsyncadd (%p2270_p8), [#allocation10], 4294967168  ;;  %1434 = vmatprep.subr.bf16.mxu0 %v1795_v0  ;;  %1438 = vmatprep.mubr.msk.bf16.mxu0 %vm1796_vm0, %v1795_v0  ;;  %v2059_v3 = vld [vmem:[%s514_s15] sm:$0xf]  ;;  %v1380_v4 = vld [vmem:[%s2218_s5] ss:$0 sm:$0xff] }
  0x71   : > { %1442 = vmatprep.subr.bf16.mxu1 %v1795_v0  ;;  %1444 = vmatprep.mubr.msk.bf16.mxu1 %vm1796_vm0, %v1795_v0  ;;  %s1798_s21 = smov 88   ;;  %s1799_s0 = smov 120   ;;  %v579_v10 = vld [vmem:[#allocation8] sm:$0xff]  ;;  %vm655_vm2 = vcmask 64512   ;;  %v580_v14 = vld [vmem:[#allocation9] sm:$0xff]  ;;  %vm684_vm3 = vcmask 130048  }
  0x72   : > { %1435 = vmatpush3.bf16.msra.mxu0 %v1585_v1  ;;  %s1800_s26 = smov 104   ;;  %s1801_s19 = smov 32   ;;  %v578_v48 = vld [vmem:[#allocation6] sm:$0xff]  ;;  %vm749_vm4 = vcmask 1043456   ;;  %vm794_vm5 = vcmask 125952   ;;  %vm942_vm6 = vcmask 257152  }
  0x73   : > { %1436 = vmatprep.subr.bf16.mxu0 %v1795_v0  ;;  %s1802_s28 = smov 48   ;;  %s1803_s16 = smov 16   ;;  %vm1176_vm8 = vcmask 523264   ;;  %vm1251_vm9 = vcmask 257024  }
  0x74   : > { %s1804_s15 = smov 8   ;;  %s1805_s3 = smov 96  }
  0x75   : > { %s1806_s27 = smov 80   ;;  %s1807_s29 = smov 112  }
  0x76   : > { %1437 = vmatpush3.bf16.msra.mxu0 %v1586_v2  ;;  %s1808_s18 = smov 64   ;;  %p2273_p5 = scmp.ne.s32.totalorder %s2262_s30, 0 }
  0x77   : > { %1448 = vmatprep.subr.bf16.mxu0 %v1795_v0 }
  0x79   : > { %1439 = vmatmul.mubr.msk.bf16.vlgmr.msra.gmra.mxu0 %vm604_vm1, %v2059_v3 }
  0x7a   : > { %1450 = vmatprep.mubr.msk.bf16.mxu0 %vm1796_vm0, %v1795_v0 }
 0x139   : > { %v642_v5 = vpop.f32.mrf.mxu0 }
 0x13a   : > { %v2069_v6 = vadd.f32 %v1380_v4, %v642_v5 }
 0x13b   : > { %v1440_v7 = vpop.f32.mrf.mxu0 }
 0x13c   : > { %807 = vrot.lane.b32.xlu1 %v2069_v6, %s1797_s1  ;;  %660 = vrot.lane.b32.xlu0 %v2069_v6, %s1798_s21  ;;  %v657_v41 = vmul.f32 %v2069_v6, %v579_v10  ;;  %v680_v61 = vpack.c.bf16 %v2069_v6, %v2069_v6  ;;  %s2271_s1 = sld [smem:[#allocation26_spill]]  ;;  %s1408_s21 = sshll.u32 %s1916_s25, 6 }
 0x13d   : > { %v645_v8 = vpop.f32.mrf.mxu0 }
 0x13f   : > { %v1441_v9 = vpop.f32.mrf.mxu0 }
 0x140   : > { %649 = vrot.lane.b32.xlu1 %v2069_v6, %s1799_s0  ;;  %663 = vrot.lane.b32.xlu0 %v2069_v6, %s1800_s26  ;;  %s574_s0 = scalar_lea.vmem [#allocation11], %s1375_s24 }
 0x141   : > { %s1267_s26 = sshll.u32 %s574_s0, 4  ;;  %s1268_s26 = int_to_ptr.vmem [resolvable:$true] %s1267_s26 }
 0x144   : > { %668 = vrot.lane.b32.xlu0 %v579_v10, %s1801_s19 }
 0x148   : > { %811 = vrot.lane.b32.xlu0 %v579_v10, %s1802_s28 }
 0x14c   : > { %797 = vrot.lane.b32.xlu0 %v579_v10, %s1803_s16 }
 0x1ae   : > { %v661_v11 = vpop.permute.xlu0 %660  ;;  %v808_v12 = vpop.permute.xlu1 %807 }
 0x1af   : > { %v810_v17 = vsel %vm655_vm2, %v808_v12, %v661_v11 }
 0x1b0   : > { %v815_v19 = vmul.f32 %v810_v17, %v580_v14 }
 0x1b2   : > { %v664_v13 = vpop.permute.xlu0 %663  ;;  %v650_v18 = vpop.permute.xlu1 %649 }
 0x1b3   : > { %v666_v15 = vsel %vm655_vm2, %v661_v11, %v664_v13  ;;  %v796_v20 = vsel %vm655_vm2, %v664_v13, %v650_v18 }
 0x1b4   : > { %v672_v16 = vmul.f32 %v666_v15, %v580_v14  ;;  %v801_v21 = vmul.f32 %v796_v20, %v580_v14 }
 0x1b6   : > { %674 = vrot.lane.b32.xlu1 %v672_v16, %s1801_s19  ;;  %v669_v22 = vpop.permute.xlu0 %668 }
 0x1b7   : > { %v671_v24 = vmul.f32 %v669_v22, %v2069_v6  ;;  %v1587_v22 = vld [vmem:[%s2219_s6 + $0x8] sm:$0xff]  }
 0x1ba   : > { %817 = vrot.lane.b32.xlu1 %v815_v19, %s1802_s28  ;;  %v812_v23 = vpop.permute.xlu0 %811 }
 0x1bb   : > { %v814_v27 = vmul.f32 %v812_v23, %v2069_v6 }
 0x1be   : > { %803 = vrot.lane.b32.xlu1 %v801_v21, %s1803_s16  ;;  %v798_v29 = vpop.permute.xlu0 %797 }
 0x1bf   : > { %v800_v32 = vmul.f32 %v798_v29, %v2069_v6 }
 0x1c2   : > { %652 = vrot.lane.b32.xlu1 %v2069_v6, %s1804_s15 }
 0x228   : > { %v675_v25 = vpop.permute.xlu1 %674 }
 0x229   : > { %v677_v26 = vadd.f32 %v675_v25, %v671_v24  ;;  %v1588_v24 = vld [vmem:[%s2219_s6] sm:$0xff]  }
 0x22b   : > { %v679_v28 = vpack.c.bf16 %v677_v26, %v677_v26 }
 0x22c   : > { %v818_v30 = vpop.permute.xlu1 %817 }
 0x22d   : > { %v820_v31 = vadd.f32 %v818_v30, %v814_v27  ;;  %682 = vrot.lane.b32.xlu0 %v679_v28, %s1805_s3  ;;  %s1254_s3 = scalar_lea.sflag [#allocation5], %s2028_s23 }
 0x22f   : > { %v822_v33 = vpack.c.bf16 %v820_v31, %v820_v31 }
 0x230   : > { %v804_v34 = vpop.permute.xlu1 %803 }
 0x231   : > { %v806_v35 = vadd.f32 %v804_v34, %v800_v32  ;;  %827 = vrot.lane.b32.xlu0 %v822_v33, %s1806_s27  ;;  %s1717_s27 = scalar_lea.vmem %s1268_s26, 64 }
 0x232   : > { %p1718_p12 = scmp.ne.s32.totalorder %s1268_s26, %s1717_s27 }
 0x233   : > { %v821_v36 = vpack.c.bf16 %v806_v35, %v806_v35 }
 0x234   : > { %v653_v37 = vpop.permute.xlu1 %652  ;;  %p1719_p7 = pnand %p1718_p12, %p2273_p5 }
 0x235   : > { %824 = vrot.lane.b32.xlu1 %v821_v36, %s1807_s29  ;;  %v656_v38 = vsel %vm655_vm2, %v650_v18, %v653_v37  ;;  %v1389_v36 = vld [vmem:[%s2220_s7] ss:$0 sm:$0xff]  ;;  %v577_v37 = vunpack.c.l.bf16 %v2059_v3  ;;  %v1589_v3 = vld [vmem:[%s2223_s10 + $0x8] sm:$0xff]   ;;  %s1809_s29 = smov [#allocation11]  }
 0x236   : > { %v658_v39 = vmul.f32 %v656_v38, %v580_v14  ;;  %p1720_p10 = pneg %p1719_p7  ;;  %s1721_s25 = sshll.u32 %s1809_s29, 4  ;;  %s1722_s25 = int_to_ptr.vmem [resolvable:$false] %s1721_s25 }
 0x237   : > { %s1723_s24 = scalar_lea.vmem %s1722_s25, 128  ;;  %p1724_p13 = scmp.lt.s32.totalorder %s1268_s26, %s1722_s25 }
 0x238   : > { %v659_v43 = vadd.f32 %v658_v39, %v657_v41  ;;  %p1725_p0 = scmp.lt.s32.totalorder %s1723_s24, %s1717_s27 }
 0x23a   : > { %v678_v45 = vpack.c.bf16 %v659_v43, %v659_v43  ;;  %p1726_p1 = por %p1725_p0, %p1724_p13 }
 0x23c   : > { %p1727_p3 = pnand %p1726_p1, %p1720_p10 }
 0x29f   : > { %v683_v40 = vpop.permute.xlu0 %682 }
 0x2a0   : > { %v689_v42 = vsel %vm684_vm3, %v683_v40, 0 }
 0x2a1   : > { %1443 = vmatpush3.bf16.xpose.msra.mxu1 %v689_v42 }
 0x2a2   : > { %1454 = vmatprep.subr.bf16.mxu1 %v1795_v0 }
 0x2a3   : > { %v828_v44 = vpop.permute.xlu0 %827 }
 0x2a4   : > { %v833_v46 = vsel %vm684_vm3, %v828_v44, 0 }
 0x2a7   : > { %v825_v47 = vpop.permute.xlu1 %824 }
 0x2a8   : > { %1445 = vmatmul.mubr.msk.bf16.vlgmr.msra.gmra.mxu1 %vm684_vm3, %v678_v45 }
 0x2a9   : > { %1455 = vmatpush3.bf16.xpose.msra.mxu1 %v833_v46  ;;  %1456 = vmatprep.mubr.msk.bf16.mxu1 %vm1796_vm0, %v1795_v0 }
 0x2aa   : > { %1466 = vmatprep.subr.bf16.mxu1 %v1795_v0 }
 0x2b0   : > { %1457 = vmatmul.mubr.msk.bf16.vlgmr.msra.gmra.mxu1 %vm684_vm3, %v825_v47 }
 0x2b1   : > { %1470 = vmatprep.mubr.msk.bf16.mxu1 %vm1796_vm0, %v1795_v0  ;;  %1467 = vmatpush3.bf16.msra.mxu1 %v1587_v22 }
 0x2b2   : > { %1468 = vmatprep.subr.bf16.mxu1 %v1795_v0 }
 0x2b5   : > { %1469 = vmatpush3.bf16.msra.mxu1 %v1588_v24 }
 0x2b6   : > { %1482 = vmatprep.subr.bf16.mxu1 %v1795_v0 }
 0x368   : > { %v725_v49 = vpop.f32.mrf.mxu1 }
 0x369   : > { %v726_v50 = vadd.f32 %v725_v49, %v578_v48 }
 0x36a   : > { %v1446_v51 = vpop.f32.mrf.mxu1 }
 0x36b   : > { %v731_v52 = vsel %vm655_vm2, %v726_v50, -inf }
 0x36c   : > { %732 = vmax.xlane.f32.xlu0 %v731_v52  ;;  %v728_v53 = vpop.f32.mrf.mxu1 }
 0x36e   : > { %v1447_v54 = vpop.f32.mrf.mxu1 }
 0x370   : > { %v869_v55 = vpop.f32.mrf.mxu1 }
 0x371   : > { %v870_v56 = vadd.f32 %v869_v55, %v578_v48  ;;  %v1393_v55 = vld [vmem:[%s2221_s8] ss:$0 sm:$0xff] }
 0x372   : > { %v1458_v57 = vpop.f32.mrf.mxu1 }
 0x373   : > { %v875_v58 = vsel %vm655_vm2, %v870_v56, -inf  ;;  %v1394_v57 = vld [vmem:[%s2222_s9] ss:$0 sm:$0xff] }
 0x374   : > { %876 = vmax.xlane.f32.xlu1 %v875_v58  ;;  %v872_v59 = vpop.f32.mrf.mxu1 }
 0x376   : > { %v1459_v60 = vpop.f32.mrf.mxu1 }
 0x385   : > { %744 = vrot.lane.b32.xlu1 %v680_v61, %s1808_s18 }
 0x3f5   : > { %v733_v62 = vpop.xlane.xlu0 %732 }
 0x3f6   : > { %v734_v63 = vsub.f32 %v726_v50, %v733_v62  ;;  %v1590_v50 = vld [vmem:[%s2223_s10] sm:$0xff]   ;;  %v1592_v62 = vld [vmem:[%s2225_s12 + $0x10] sm:$0xff]  }
 0x3f8   : > { %v735_v1 = vmul.f32 1.442695, %v734_v63  ;;  %v1593_v63 = vld [vmem:[%s2225_s12 + $0x8] sm:$0xff]  }
 0x3fa   : > { %1595 = vpow2.f32 %v735_v1  ;;  %v1594_v1 = vld [vmem:[%s2225_s12] sm:$0xff]  }
 0x3fd   : > { %v877_v2 = vpop.xlane.xlu1 %876 }
 0x3fe   : > { %v878_v4 = vsub.f32 %v870_v56, %v877_v2  ;;  %v1395_v2 = vld [vmem:[%s2224_s11] ss:$0 sm:$0xff] }
 0x400   : > { %v879_v5 = vmul.f32 1.442695, %v878_v4 }
 0x401   : > { %v745_v7 = vpop.permute.xlu1 %744 }
 0x402   : > { %1597 = vpow2.f32 %v879_v5  ;;  %v751_v8 = vsel %vm749_vm4, %v745_v7, 0 }
 0x403   : > { %1449 = vmatpush3.bf16.msra.mxu0 %v751_v8 }
 0x404   : > { %1460 = vmatprep.subr.bf16.mxu0 %v1795_v0 }
 0x407   : > { %v1596_v9 = vpop.eup %1595 }
 0x408   : > { %v737_v6 = vsel %vm655_vm2, %v1596_v9, 0.0 }
 0x409   : > { %738 = vadd.xlane.f32.xlu0 %v737_v6 }
 0x40f   : > { %v1598_v10 = vpop.eup %1597 }
 0x410   : > { %v881_v11 = vsel %vm655_vm2, %v1598_v10, 0.0 }
 0x411   : > { %882 = vadd.xlane.f32.xlu0 %v881_v11 }
 0x427   : > { %887 = vrot.lane.b32.xlu0 %v680_v61, %s1802_s28  ;;  %v1591_v61 = vld [vmem:[%s2225_s12 + $0x18] sm:$0xff]  }
 0x492   : > { %v739_v12 = vpop.xlane.xlu0 %738 }
 0x493   : > { %1599 = vrcp.f32 %v739_v12 }
 0x49a   : > { %v883_v13 = vpop.xlane.xlu0 %882 }
 0x49b   : > { %1601 = vrcp.f32 %v883_v13 }
 0x49e   : > { %v888_v16 = vpop.permute.xlu0 %887 }
 0x49f   : > { %v893_v18 = vsel %vm749_vm4, %v888_v16, 0 }
 0x4a0   : > { %v1600_v14 = vpop.eup %1599 }
 0x4a1   : > { %v741_v15 = vmul.f32 %v1600_v14, %v1596_v9 }
 0x4a3   : > { %v742_v17 = vpack.c.bf16 %v741_v15, %v741_v15 }
 0x4a5   : > { %1451 = vmatmul.mubr.msk.bf16.vlgmr.msra.gmra.mxu0 %vm655_vm2, %v742_v17 }
 0x4a6   : > { %1461 = vmatpush3.bf16.msra.mxu0 %v893_v18  ;;  %1462 = vmatprep.mubr.msk.bf16.mxu0 %vm1796_vm0, %v1795_v0 }
 0x4a7   : > { %1474 = vmatprep.subr.bf16.mxu0 %v1795_v0 }
 0x4a8   : > { %v1602_v19 = vpop.eup %1601 }
 0x4a9   : > { %v885_v20 = vmul.f32 %v1602_v19, %v1598_v10 }
 0x4ab   : > { %v886_v21 = vpack.c.bf16 %v885_v20, %v885_v20 }
 0x4ad   : > { %1463 = vmatmul.mubr.msk.bf16.vlgmr.msra.gmra.mxu0 %vm655_vm2, %v886_v21 }
 0x4ae   : > { %1478 = vmatprep.mubr.msk.bf16.mxu0 %vm1796_vm0, %v1795_v0  ;;  %1475 = vmatpush3.bf16.msra.mxu0 %v1589_v3 }
 0x4af   : > { %1476 = vmatprep.subr.bf16.mxu0 %v1795_v0 }
 0x4b2   : > { %1477 = vmatpush3.bf16.msra.mxu0 %v1590_v50  ;;  %v1405_v50 = vld [vmem:[%s2227_s14] ss:$0 sm:$0xff] }
 0x565   : > { %v787_v23 = vpop.f32.mrf.mxu0 }
 0x566   : > { %v793_v25 = vpack.c.bf16 %v787_v23, %v787_v23 }
 0x567   : > { %v1452_v26 = vpop.f32.mrf.mxu0 }
 0x568   : > { %795 = vst.msk [vmem:[#allocation2] sm:$0xf] %vm794_vm5, %v793_v25 }
 0x569   : > { %v790_v27 = vpop.f32.mrf.mxu0 }
 0x56b   : > { %v1453_v28 = vpop.f32.mrf.mxu0 }
 0x56d   : > { %v929_v29 = vpop.f32.mrf.mxu0 }
 0x56e   : > { %v1411_v30 = vpack.c.bf16 %v929_v29, %v929_v29 }
 0x56f   : > { %v1464_v31 = vpop.f32.mrf.mxu0 }
 0x570   : > { %939 = vrot.lane.b32.xlu1 %v1411_v30, %s1803_s16  ;;  %s2272_s16 = sld [smem:[#allocation27_spill]] }
 0x571   : > { %v932_v32 = vpop.f32.mrf.mxu0 }
 0x573   : > { %v1465_v33 = vpop.f32.mrf.mxu0 }
 0x576   : > { %s1265_s15 = scalar_lea.hbm %s2272_s16, %s1408_s21 }
 0x5e2   : > { %v940_v34 = vpop.permute.xlu1 %939 }
 0x5e3   : > { %943 = vst.msk [vmem:[#allocation2] sm:$0xf] %vm942_vm6, %v940_v34  ;;  %v1399_v34 = vld [vmem:[%s2226_s13] ss:$0 sm:$0xff] }
 0x5ea   : > { %v944_v35 = vld [vmem:[#allocation2] sm:$0xf] }
 0x5eb   : > { %1471 = vmatmul.mubr.msk.bf16.vlgmr.msra.gmra.mxu1 %vm604_vm1, %v944_v35 }
 0x5ec   : > { %1490 = vmatprep.mubr.msk.bf16.mxu1 %vm1796_vm0, %v1795_v0  ;;  %1483 = vmatpush3.bf16.msra.mxu1 %v1591_v61 }
 0x5ed   : > { %1484 = vmatprep.subr.bf16.mxu1 %v1795_v0 }
 0x5f0   : > { %1485 = vmatpush3.bf16.msra.mxu1 %v1592_v62 }
 0x5f1   : > { %1486 = vmatprep.subr.bf16.mxu1 %v1795_v0 }
 0x5f4   : > { %1487 = vmatpush3.bf16.msra.mxu1 %v1593_v63 }
 0x5f5   : > { %1488 = vmatprep.subr.bf16.mxu1 %v1795_v0 }
 0x5f8   : > { %1489 = vmatpush3.bf16.msra.mxu1 %v1594_v1 }
 0x6ab   : > { %v1005_v38 = vpop.f32.mrf.mxu1 }
 0x6ac   : > { %v1006_v39 = vadd.f32 %v1389_v36, %v1005_v38 }
 0x6ad   : > { %v1472_v40 = vpop.f32.mrf.mxu1 }
 0x6ae   : > { %v1011_v41 = vadd.f32 %v1006_v39, %v577_v37 }
 0x6af   : > { %v1008_v42 = vpop.f32.mrf.mxu1 }
 0x6b0   : > { %v1014_v43 = vsel %vm604_vm1, %v1011_v41, 0.0 }
 0x6b1   : > { %v1473_v44 = vpop.f32.mrf.mxu1  ;;  %1015 = vadd.xlane.f32.xlu1 %v1014_v43 }
 0x73a   : > { %v1016_v45 = vpop.xlane.xlu1 %1015 }
 0x73b   : > { %v1018_v46 = vmul.f32 0.03125, %v1016_v45 }
 0x73d   : > { %v1019_v47 = vsub.f32 %v1011_v41, %v1018_v46 }
 0x73f   : > { %v1020_v48 = vmul.f32 %v1019_v47, %v1019_v47 }
 0x741   : > { %v1021_v49 = vsel %vm604_vm1, %v1020_v48, 0.0 }
 0x742   : > { %1022 = vadd.xlane.f32.xlu0 %v1021_v49 }
 0x7cb   : > { %v1023_v51 = vpop.xlane.xlu0 %1022 }
 0x7cc   : > { %v1024_v52 = vmul.f32 0.03125, %v1023_v51 }
 0x7ce   : > { %v1025_v53 = vadd.f32 1e-12, %v1024_v52  ;;  %v1406_v52 = vld [vmem:[%s2271_s1] ss:$0 sm:$0xff] }
 0x7d0   : > { %1603 = vrsqrt.f32 %v1025_v53 }
 0x7dd   : > { %v1604_v54 = vpop.eup %1603 }
 0x7de   : > { %v1027_v56 = vmul.f32 %v1604_v54, %v1019_v47 }
 0x7e0   : > { %v1034_v58 = vmul.f32 %v1393_v55, %v1027_v56 }
 0x7e2   : > { %v1041_v59 = vadd.f32 %v1394_v57, %v1034_v58 }
 0x7e4   : > { %v1042_v60 = vpack.c.bf16 %v1041_v59, %v1041_v59 }
 0x7e6   : > { %1479 = vmatmul.mubr.msk.bf16.vlgmr.msra.gmra.mxu0 %vm604_vm1, %v1042_v60 }
 0x8a6   : > { %v1103_v4 = vpop.f32.mrf.mxu0 }
 0x8a7   : > { %v1104_v5 = vadd.f32 %v1395_v2, %v1103_v4 }
 0x8a8   : > { %v1480_v7 = vpop.f32.mrf.mxu0 }
 0x8a9   : > { %v1110_v8 = vmul.f32 0.70710677, %v1104_v5  ;;  %v1109_v30 = vmul.f32 0.5, %v1104_v5 }
 0x8aa   : > { %v1106_v9 = vpop.f32.mrf.mxu0 }
 0x8ab   : > { %v1111_v6 = vand.u32 2147483647, %v1110_v8  ;;  %vm1131_vm7 = vcmp.lt.f32.partialorder %v1110_v8, 0.0 }
 0x8ac   : > { %v1481_v10 = vpop.f32.mrf.mxu0 }
 0x8ad   : > { %v1112_v11 = vmul.f32 0.3275911, %v1111_v6  ;;  %v1125_v0 = vsub.f32 0.0, %v1111_v6 }
 0x8af   : > { %v1113_v12 = vadd.f32 1.0, %v1112_v11  ;;  %v1126_v13 = vmul.f32 %v1125_v0, %v1111_v6 }
 0x8b1   : > { %1605 = vrcp.f32 %v1113_v12  ;;  %v1127_v16 = vmul.f32 1.442695, %v1126_v13 }
 0x8b3   : > { %1607 = vpow2.f32 %v1127_v16 }
 0x8be   : > { %v1606_v14 = vpop.eup %1605 }
 0x8bf   : > { %v1116_v15 = vmul.f32 1.0614054, %v1606_v14 }
 0x8c0   : > { %v1608_v25 = vpop.eup %1607 }
 0x8c1   : > { %v1117_v17 = vadd.f32 -1.4531521, %v1116_v15 }
 0x8c3   : > { %v1118_v18 = vmul.f32 %v1606_v14, %v1117_v17 }
 0x8c5   : > { %v1119_v19 = vadd.f32 1.4214138, %v1118_v18 }
 0x8c7   : > { %v1120_v20 = vmul.f32 %v1606_v14, %v1119_v19 }
 0x8c9   : > { %v1121_v21 = vadd.f32 -0.28449672, %v1120_v20 }
 0x8cb   : > { %v1122_v22 = vmul.f32 %v1606_v14, %v1121_v21 }
 0x8cd   : > { %v1123_v23 = vadd.f32 0.2548296, %v1122_v22 }
 0x8cf   : > { %v1124_v24 = vmul.f32 %v1606_v14, %v1123_v23 }
 0x8d1   : > { %v1129_v26 = vmul.f32 %v1608_v25, %v1124_v24 }
 0x8d3   : > { %v1130_v27 = vsub.f32 1.0, %v1129_v26 }
 0x8d5   : > { %v1132_v28 = vsub.f32 0.0, %v1130_v27 }
 0x8d7   : > { %v1133_v29 = vsel %vm1131_vm7, %v1132_v28, %v1130_v27 }
 0x8d8   : > { %v1134_v31 = vadd.f32 1.0, %v1133_v29 }
 0x8da   : > { %v1135_v32 = vmul.f32 %v1134_v31, %v1109_v30 }
 0x8dc   : > { %v1136_v33 = vpack.c.bf16 %v1135_v32, %v1135_v32 }
 0x8de   : > { %1491 = vmatmul.mubr.msk.bf16.vlgmr.msra.gmra.mxu1 %vm1176_vm8, %v1136_v33 }
 0x99e   : > { %v1214_v35 = vpop.f32.mrf.mxu1 }
 0x99f   : > { %v1215_v36 = vadd.f32 %v1399_v34, %v1214_v35 }
 0x9a0   : > { %v1492_v37 = vpop.f32.mrf.mxu1 }
 0x9a1   : > { %v1220_v38 = vadd.f32 %v1215_v36, %v1041_v59 }
 0x9a2   : > { %v1217_v39 = vpop.f32.mrf.mxu1 }
 0x9a3   : > { %v1223_v40 = vsel %vm604_vm1, %v1220_v38, 0.0 }
 0x9a4   : > { %1224 = vadd.xlane.f32.xlu0 %v1223_v40  ;;  %v1493_v41 = vpop.f32.mrf.mxu1 }
 0xa2d   : > { %v1225_v42 = vpop.xlane.xlu0 %1224 }
 0xa2e   : > { %v1226_v43 = vmul.f32 0.03125, %v1225_v42 }
 0xa30   : > { %v1227_v44 = vsub.f32 %v1220_v38, %v1226_v43 }
 0xa32   : > { %v1228_v45 = vmul.f32 %v1227_v44, %v1227_v44 }
 0xa34   : > { %v1229_v46 = vsel %vm604_vm1, %v1228_v45, 0.0 }
 0xa35   : > { %1230 = vadd.xlane.f32.xlu1 %v1229_v46 }
 0xabe   : > { %v1231_v47 = vpop.xlane.xlu1 %1230 }
 0xabf   : > { %v1232_v48 = vmul.f32 0.03125, %v1231_v47 }
 0xac1   : > { %v1233_v49 = vadd.f32 1e-12, %v1232_v48 }
 0xac3   : > { %1609 = vrsqrt.f32 %v1233_v49 }
 0xad0   : > { %v1610_v3 = vpop.eup %1609 }
 0xad1   : > { %v1235_v51 = vmul.f32 %v1610_v3, %v1227_v44 }
 0xad3   : > { %v1242_v53 = vmul.f32 %v1405_v50, %v1235_v51 }
 0xad5   : > { %v1249_v54 = vadd.f32 %v1406_v52, %v1242_v53 }
 0xad7   : > { %v1250_v55 = vpack.c.bf16 %v1249_v54, %v1249_v54 }
 0xad9   : > { %1252 = vst.msk [vmem:[%s574_s0] sm:$0xf] %vm1251_vm9, %v1250_v55 }
 0xada   : > { %1730 = shalt.err (!%p1727_p3)
}
 0xadb   : > { %s1731_s18 = scalar_lea.hbm %s1265_s15, 64  ;;  %s1735_s17 = scalar_lea.hbm %s2272_s16, 128 }
 0xadc   : > { %p1732_p4 = scmp.ne.s32.totalorder %s1265_s15, %s1731_s18  ;;  %p1736_p11 = scmp.lt.s32.totalorder %s1265_s15, %s2272_s16 }
 0xadd   : > { %p1737_p6 = scmp.lt.s32.totalorder %s1735_s17, %s1731_s18 }
 0xade   : > { %p1733_p2 = pnand %p1732_p4, %p2273_p5 }
 0xadf   : > { %p1738_p8 = por %p1737_p6, %p1736_p11 }
 0xae0   : > { %p1734_p9 = pneg %p1733_p2 }
 0xae2   : > { %p1739_p12 = pnand %p1738_p8, %p1734_p9 }
 0xae4   : > { %1742 = shalt.err (!%p1739_p12)
}
 0xae5   : > { %1508 = dma.vmem_to_hbm [thread:$0]  (%p2273_p5), %s1268_s26, 64, %s1265_s15, %s1254_s3  }
 0xae6 PF: > { %s2274_s0 = sld [smem:[#allocation16_spill]] }
 0xae7   : > { %s2275_s19 = sld [smem:[#allocation19_spill]] }
 0xae8   : > { %s2276_s28 = sld [smem:[#allocation18_spill]] }
 0xaec   : > { %s1279_s27 = sand.u32 1, %s2274_s0  }
 0xaed   : > { %p2277_p7 = scmp.ne.s32.totalorder %s2275_s19, 0  ;;  %s1280_s29 = scalar_lea.sflag [#allocation5], %s1279_s27 }
 0xaee   : > { %p2278_p10 = scmp.ge.s32.totalorder %s2276_s28, 2 }
 0xaf0   : > { %p1525_p13 = pnand %p2278_p10, %p2277_p7 }
 0xaf2   : > { %p1526_p0 = pneg %p1525_p13 }
 0xaf4   : > { %1772 = dma.done.wait (%p1526_p0), %s1280_s29, 64  }
 0xaf5   : > { %1774 = vsyncadd (%p1526_p0), %s1280_s29, 4294967232  ;;  %s2279_s24 = sld [smem:[#allocation20_spill]]  ;;  %s2282_s21 = smov %s1781_s22 }
 0xaf6   : > { %s2280_s25 = sld [smem:[#allocation17_spill]] }
 0xaf7   : > { %s2281_s23 = sld [smem:[#allocation21_spill]] }
 0xafb   : > { %p31_p1 = scmp.ge.s32.totalorder %s2279_s24, 4  }
 0xafc   : > { %s2283_s22 = smov %s2280_s25 }
 0xafd   :  { %33 = sbr.rel (!%p31_p1) target bundleno = 14 (0xe), region = 141 }
 0xb02   :  { %1285 = vsyncpa [#allocation4], 1 }
 0xb03   :  { %1287 = vsyncpa [#allocation4 + $0x1], 1 }
 0xb04   :  { %1288 = vsyncpa [#allocation7], 1 }
 0xb05   :  { %1289 = vsyncpa [#allocation10], 1 }
 0xb06   :  { %1290 = vsyncpa [#allocation5], 1 }
 0xb07   :  { %1292 = vsyncpa [#allocation5 + $0x1], 1 }

// kernel: tpu_custom_call.1
= control target key start
LH: loop header
LB: loop body
LE: loop exit
PB: predicated region body
PF: predicated region fallthrough
CT: control target
= control target key end

     0   :  { %s2213_s0 = inlined_call_operand.hbm [shape: bf16[2,8,32], index: 0, kind: input, shape index: {}]   ;;  %s2214_s1 = inlined_call_operand.hbm [shape: f32[1,8,8], index: 1, kind: input, shape index: {}]   ;;  %s2215_s2 = inlined_call_operand.hbm [shape: f32[8,16], index: 2, kind: input, shape index: {}]   ;;  %s2216_s3 = inlined_call_operand.hbm [shape: f32[8,16], index: 3, kind: input, shape index: {}]   ;;  %s2217_s4 = inlined_call_operand.vmem [shape: bf16[32,96], index: 4, kind: input, shape index: {}]   ;;  %s2218_s5 = inlined_call_operand.vmem [shape: f32[1,96], index: 5, kind: input, shape index: {}]   ;;  %s2219_s6 = inlined_call_operand.vmem [shape: bf16[32,32], index: 6, kind: input, shape index: {}]   ;;  %s2220_s7 = inlined_call_operand.vmem [shape: f32[1,32], index: 7, kind: input, shape index: {}]   ;;  %s2221_s8 = inlined_call_operand.vmem [shape: f32[1,32], index: 8, kind: input, shape index: {}]   ;;  %s2222_s9 = inlined_call_operand.vmem [shape: f32[1,32], index: 9, kind: input, shape index: {}]   ;;  %s2223_s10 = inlined_call_operand.vmem [shape: bf16[32,64], index: 10, kind: input, shape index: {}]   ;;  %s2224_s11 = inlined_call_operand.vmem [shape: f32[1,64], index: 11, kind: input, shape index: {}]   ;;  %s2225_s12 = inlined_call_operand.vmem [shape: bf16[64,32], index: 12, kind: input, shape index: {}]   ;;  %s2226_s13 = inlined_call_operand.vmem [shape: f32[1,32], index: 13, kind: input, shape index: {}]   ;;  %s2227_s14 = inlined_call_operand.vmem [shape: f32[1,32], index: 14, kind: input, shape index: {}]   ;;  %s2228_s15 = inlined_call_operand.vmem [shape: f32[1,32], index: 15, kind: input, shape index: {}]   ;;  %s2229_s16 = inlined_call_operand.hbm [shape: bf16[2,8,32], index: 16, kind: output, shape index: {}]  }
   0x1   :  { %2242 = sst [smem:[#allocation22_spill]] %s2213_s0 }
   0x2   :  { %2243 = sst [smem:[#allocation23_spill]] %s2214_s1 }
   0x3   :  { %2244 = sst [smem:[#allocation24_spill]] %s2215_s2 }
   0x4   :  { %2245 = sst [smem:[#allocation25_spill]] %s2216_s3 }
   0x5   :  { %2246 = sst [smem:[#allocation26_spill]] %s2228_s15 }
   0x6   :  { %2247 = sst [smem:[#allocation27_spill]] %s2229_s16 }
   0x7   :  { %21 = vsyncpa [#allocation4], 0 }
   0x8   :  { %23 = vsyncpa [#allocation4 + $0x1], 0 }
   0x9   :  { %24 = vsyncpa [#allocation7], 0 }
   0xa   :  { %25 = vsyncpa [#allocation10], 0 }
   0xb   :  { %26 = vsyncpa [#allocation5], 0 }
   0xc   :  { %28 = vsyncpa [#allocation5 + $0x1], 0  ;;  %s1895_s21 = smov 0   ;;  %s1897_s22 = smov 0  }
   0xd   :  { %s1899_s23 = smov 0   ;;  %s1901_s24 = smov 0  }
   0xe LB: > { %2248 = sst [smem:[#allocation16_spill]] %s1777_s21  ;;  %s1916_s25 = sadd.s32 4294967295, %s1789_s24   ;;  %s1789_s24 = sphi %s1901_s24, %s2279_s24   ;;  %s1785_s23 = sphi %s1899_s23, %s2281_s23   ;;  %s1781_s22 = sphi %s1897_s22, %s2283_s22   ;;  %s1777_s21 = sphi %s1895_s21, %s2282_s21  }
   0xf   : > { %2249 = sst [smem:[#allocation17_spill]] %s1785_s23  ;;  %s1366_s26 = sadd.s32 4294967294, %s1789_s24  }
  0x10   : > { %2250 = sst [smem:[#allocation18_spill]] %s1789_s24  ;;  %p54_p0 = scmp.ne.s32.totalorder %s1781_s22, %s1777_s21 }
  0x11   : > { %p2232_p1 = scmp.eq.s32.totalorder %s1916_s25, 0  ;;  %p399_p3 = scmp.eq.s32.totalorder %s1366_s26, 1 }
  0x12   : > { %p1367_p5 = scmp.ge.s32.totalorder %s1789_s24, 1  ;;  %p406_p7 = scmp.lt.s32.totalorder %s1789_s24, 3 }
  0x13   : > { %p1925_p4 = por %p2232_p1, %p54_p0  ;;  %p1930_p6 = por %p399_p3, %p54_p0 }
  0x14   : > { %p1935_p8 = pnand %p1367_p5, %p406_p7  ;;  %s1791_s30 = smov [#allocation6]  }
  0x15   : > { %s2251_s27 = scalar_select %p1925_p4, 1, 0 }
  0x16   : > { %s2252_s28 = scalar_select %p1930_p6, 1, 0 }
  0x17   : > { %s2254_s29 = scalar_select %p1935_p8, 1, 0 }
  0x18   : > { %2253 = sst [smem:[#allocation19_spill]] %s2252_s28  ;;  %s419_s0 = sshll.u32 %s1791_s30, 4  ;;  %s420_s0 = int_to_ptr.vmem [resolvable:$true] %s419_s0 }
  0x19   : > { %p1510_p10 = pneg %p1935_p8  ;;  %s1792_s17 = smov [#allocation8]  }
  0x1a   : > { %s430_s18 = sshll.u32 %s1792_s17, 4  ;;  %s1793_s20 = smov [#allocation9]   ;;  %s431_s18 = int_to_ptr.vmem [resolvable:$true] %s430_s18 }
  0x1b   : > { %p1944_p11 = pnand %p1510_p10, %p2232_p1  ;;  %s441_s26 = sshll.u32 %s1793_s20, 4  ;;  %s1948_s26 = int_to_ptr.vmem [resolvable:$true] %s441_s26 }
  0x1c   : > { %s1622_s30 = scalar_lea.vmem %s420_s0, 128  ;;  %p1630_p5 = scmp.lt.s32.totalorder %s420_s0, %s420_s0 }
  0x1d   : > { %p1613_p12 = pneg %p1944_p11  ;;  %p1623_p13 = scmp.ne.s32.totalorder %s420_s0, %s1622_s30 }
  0x1e   : > { %p1631_p7 = scmp.lt.s32.totalorder %s1622_s30, %s1622_s30 }
  0x1f   : > { %p1625_p0 = pnand %p1623_p13, %p1613_p12 }
  0x20   : > { %p1632_p10 = por %p1631_p7, %p1630_p5 }
  0x21   : > { %p1626_p3 = pneg %p1625_p0 }
  0x23   : > { %p1633_p9 = pnand %p1632_p10, %p1626_p3 }
  0x25   : > { %1636 = shalt.err (!%p1633_p9)
}
  0x26   : > { %s2256_s1 = sld [smem:[#allocation23_spill]]  ;;  %s1648_s20 = scalar_lea.vmem %s431_s18, 128 }
  0x27   : > { %p1649_p1 = scmp.ne.s32.totalorder %s431_s18, %s1648_s20  ;;  %p1656_p13 = scmp.lt.s32.totalorder %s431_s18, %s431_s18 }
  0x28   : > { %p1657_p0 = scmp.lt.s32.totalorder %s1648_s20, %s1648_s20 }
  0x29   : > { %p1651_p2 = pnand %p1649_p1, %p1613_p12 }
  0x2a   : > { %p1658_p4 = por %p1657_p0, %p1656_p13 }
  0x2b   : > { %p1652_p6 = pneg %p1651_p2 }
  0x2c   : > { %1513 = dma.hbm_to_vmem [thread:$0]  (!%p1944_p11), %s2256_s1, 128, %s420_s0, [#allocation7]  }
  0x2d   : > { %p1659_p8 = pnand %p1658_p4, %p1652_p6 }
  0x2f   : > { %1662 = shalt.err (!%p1659_p8)
}
  0x30   : > { %s2257_s2 = sld [smem:[#allocation24_spill]]  ;;  %s1674_s28 = scalar_lea.vmem %s1948_s26, 128 }
  0x31   : > { %p1675_p9 = scmp.ne.s32.totalorder %s1948_s26, %s1674_s28  ;;  %p1682_p3 = scmp.lt.s32.totalorder %s1948_s26, %s1948_s26 }
  0x32   : > { %p1683_p4 = scmp.lt.s32.totalorder %s1674_s28, %s1674_s28 }
  0x33   : > { %p1677_p1 = pnand %p1675_p9, %p1613_p12 }
  0x34   : > { %p1684_p6 = por %p1683_p4, %p1682_p3 }
  0x35   : > { %p1678_p2 = pneg %p1677_p1 }
  0x36   : > { %1516 = dma.hbm_to_vmem [thread:$0]  (!%p1944_p11), %s2257_s2, 128, %s431_s18, [#allocation7]  }
  0x37   : > { %p1685_p8 = pnand %p1684_p6, %p1678_p2 }
  0x39   : > { %1688 = shalt.err (!%p1685_p8)
}
  0x3a   : > { %s2258_s3 = sld [smem:[#allocation25_spill]]  ;;  %s1982_s18 = sadd.s32 1, %s1789_s24  }
  0x3b   : > { %2259 = sst [smem:[#allocation20_spill]] %s1982_s18  ;;  %s38_s19 = ssub.s32 %s1789_s24, %s1982_s18 }
  0x3c   : > { %s41_s17 = sadd.s32 1, %s1785_s23  ;;  %p39_p12 = scmp.eq.s32.totalorder %s38_s19, 0 }
  0x3d   : > { %p48_p5 = scmp.ne.s32.totalorder %s1785_s23, %s1781_s22  ;;  %p49_p7 = scmp.eq.s32.totalorder %s1789_s24, 0 }
  0x3e   : > { %p1531_p10 = scmp.lt.s32.totalorder %s1789_s24, 2  ;;  %p2261_p0 = scmp.eq.s32.totalorder %s1916_s25, 1 }
  0x3f   : > { %s1992_s20 = scalar_select %p39_p12, %s1785_s23, %s41_s17  }
  0x40   : > { %1519 = dma.hbm_to_vmem [thread:$0]  (!%p1944_p11), %s2258_s3, 128, %s1948_s26, [#allocation10]  }
  0x41   : > { %2260 = sst [smem:[#allocation21_spill]] %s1992_s20  ;;  %p50_p13 = por %p49_p7, %p48_p5 }
  0x42   : > { %p1996_p9 = por %p2261_p0, %p48_p5  ;;  %s488_s28 = sand.u32 1, %s1785_s23  }
  0x43   : > { %s1373_s21 = sshll.u32 %s1789_s24, 6  ;;  %s1372_s26 = sshll.u32 %s488_s28, 2 }
  0x44   : > { %s2262_s30 = scalar_select %p1996_p9, 1, 0 }
  0x45   : > { %s2263_s2 = sld [smem:[#allocation22_spill]]  ;;  %s492_s19 = scalar_lea.vmem [#allocation3], %s1372_s26 }
  0x46   : > { %s499_s17 = sshll.u32 %s492_s19, 4  ;;  %p2007_p11 = pnand %p1531_p10, %p50_p13  ;;  %s500_s17 = int_to_ptr.vmem [resolvable:$true] %s499_s17 }
  0x47   : > { %s489_s18 = scalar_lea.sflag [#allocation4], %s488_s28 }
  0x48   : > { %p1691_p2 = pneg %p2007_p11 }
  0x4b   : > { %s2005_s3 = scalar_lea.hbm %s2263_s2, %s1373_s21  ;;  %s1694_s0 = scalar_lea.hbm %s2263_s2, 128 }
  0x4c   : > { %s1689_s23 = scalar_lea.hbm %s2005_s3, 64  ;;  %p1695_p6 = scmp.lt.s32.totalorder %s2005_s3, %s2263_s2 }
  0x4d   : > { %p1690_p1 = scmp.ne.s32.totalorder %s2005_s3, %s1689_s23  ;;  %p1696_p8 = scmp.lt.s32.totalorder %s1694_s0, %s1689_s23 }
  0x4f   : > { %p1692_p3 = pnand %p1691_p2, %p1690_p1  ;;  %p1697_p12 = por %p1696_p8, %p1695_p6 }
  0x51   : > { %p1693_p4 = pneg %p1692_p3 }
  0x53   : > { %p1698_p5 = pnand %p1697_p12, %p1693_p4 }
  0x55   : > { %1701 = shalt.err (!%p1698_p5)
}
  0x56   : > { %s1702_s19 = scalar_lea.vmem %s500_s17, 64  ;;  %s1794_s28 = smov [#allocation3]  }
  0x57   : > { %p1703_p7 = scmp.ne.s32.totalorder %s500_s17, %s1702_s19  ;;  %s1707_s16 = sshll.u32 %s1794_s28, 4  ;;  %s1708_s16 = int_to_ptr.vmem [resolvable:$false] %s1707_s16 }
  0x58   : > { %s1709_s15 = scalar_lea.vmem %s1708_s16, 128  ;;  %p1710_p0 = scmp.lt.s32.totalorder %s500_s17, %s1708_s16 }
  0x59   : > { %p1705_p10 = pnand %p1703_p7, %p1691_p2  ;;  %p1711_p1 = scmp.lt.s32.totalorder %s1709_s15, %s1702_s19 }
  0x5b   : > { %p1706_p13 = pneg %p1705_p10  ;;  %p1712_p3 = por %p1711_p1, %p1710_p0 }
  0x5d   : > { %p1713_p9 = pnand %p1712_p3, %p1706_p13 }
  0x5f   : > { %1716 = shalt.err (!%p1713_p9)
}
  0x60   : > { %1523 = dma.hbm_to_vmem [thread:$0]  (!%p2007_p11), %s2005_s3, 64, %s500_s17, %s489_s18  }
  0x61   : > { %p2265_p4 = scmp.ne.s32.totalorder %s2254_s29, 0 }
  0x62   : > { %s2028_s23 = sand.u32 (!%p2265_p4), 1, %s1781_s22   ;;  %p2266_p2 = scmp.ne.s32.totalorder (!%p2265_p4), %s2251_s27, 0 }
  0x63   : > { %508 = sbr.rel (%p2265_p4) target bundleno = 2790 (0xae6), region = 84  ;;  %s1375_s24 = sshll.u32 (!%p2265_p4), %s2028_s23, 2 }
  0x64   : > { %s511_s16 = scalar_lea.sflag (!%p2265_p4), [#allocation4], %s2028_s23  ;;  %s514_s15 = scalar_lea.vmem (!%p2265_p4), [#allocation3], %s1375_s24 }
  0x68   : > { %1760 = dma.done.wait (%p2266_p2), %s511_s16, 64  }
  0x69   : > { %1762 = vsyncadd (%p2266_p2), %s511_s16, 4294967232  ;;  %p2267_p9 = scmp.eq.s32.totalorder %s1916_s25, 0 }
  0x6b   : > { %1764 = dma.done.wait (%p2267_p9), [#allocation7], 256   ;;  %p2268_p11 = pmov %p2267_p9 }
  0x6c   : > { %p2269_p6 = pmov %p2267_p9 }
  0x6d   : > { %1766 = vsyncadd (%p2268_p11), [#allocation7], 4294967040 }
  0x6e   : > { %1768 = dma.done.wait (%p2269_p6), [#allocation10], 128   ;;  %p2270_p8 = pmov %p2269_p6 }
  0x6f   : > { %v1795_v0 = vmov 0.0   ;;  %vm1796_vm0 = vmmov 0   ;;  %v1585_v1 = vld [vmem:[%s2217_s4 + $0x8] sm:$0xff]   ;;  %v1586_v2 = vld [vmem:[%s2217_s4] sm:$0xff]   ;;  %vm604_vm1 = vcmask 261120   ;;  %s1797_s1 = smov 72  }
  0x70   : > { %1770 = vsyncadd (%p2270_p8), [#allocation10], 4294967168  ;;  %1434 = vmatprep.subr.bf16.mxu0 %v1795_v0  ;;  %1438 = vmatprep.mubr.msk.bf16.mxu0 %vm1796_vm0, %v1795_v0  ;;  %v2059_v3 = vld [vmem:[%s514_s15] sm:$0xf]  ;;  %v1380_v4 = vld [vmem:[%s2218_s5] ss:$0 sm:$0xff] }
  0x71   : > { %1442 = vmatprep.subr.bf16.mxu1 %v1795_v0  ;;  %1444 = vmatprep.mubr.msk.bf16.mxu1 %vm1796_vm0, %v1795_v0  ;;  %s1798_s21 = smov 88   ;;  %s1799_s0 = smov 120   ;;  %v579_v10 = vld [vmem:[#allocation8] sm:$0xff]  ;;  %vm655_vm2 = vcmask 64512   ;;  %v580_v14 = vld [vmem:[#allocation9] sm:$0xff]  ;;  %vm684_vm3 = vcmask 130048  }
  0x72   : > { %1435 = vmatpush3.bf16.msra.mxu0 %v1585_v1  ;;  %s1800_s26 = smov 104   ;;  %s1801_s19 = smov 32   ;;  %v578_v48 = vld [vmem:[#allocation6] sm:$0xff]  ;;  %vm749_vm4 = vcmask 1043456   ;;  %vm794_vm5 = vcmask 125952   ;;  %vm942_vm6 = vcmask 257152  }
  0x73   : > { %1436 = vmatprep.subr.bf16.mxu0 %v1795_v0  ;;  %s1802_s28 = smov 48   ;;  %s1803_s16 = smov 16   ;;  %vm1176_vm8 = vcmask 523264   ;;  %vm1251_vm9 = vcmask 257024  }
  0x74   : > { %s1804_s15 = smov 8   ;;  %s1805_s3 = smov 96  }
  0x75   : > { %s1806_s27 = smov 80   ;;  %s1807_s29 = smov 112  }
  0x76   : > { %1437 = vmatpush3.bf16.msra.mxu0 %v1586_v2  ;;  %s1808_s18 = smov 64   ;;  %p2273_p5 = scmp.ne.s32.totalorder %s2262_s30, 0 }
  0x77   : > { %1448 = vmatprep.subr.bf16.mxu0 %v1795_v0 }
  0x79   : > { %1439 = vmatmul.mubr.msk.bf16.vlgmr.msra.gmra.mxu0 %vm604_vm1, %v2059_v3 }
  0x7a   : > { %1450 = vmatprep.mubr.msk.bf16.mxu0 %vm1796_vm0, %v1795_v0 }
 0x139   : > { %v642_v5 = vpop.f32.mrf.mxu0 }
 0x13a   : > { %v2069_v6 = vadd.f32 %v1380_v4, %v642_v5 }
 0x13b   : > { %v1440_v7 = vpop.f32.mrf.mxu0 }
 0x13c   : > { %807 = vrot.lane.b32.xlu1 %v2069_v6, %s1797_s1  ;;  %660 = vrot.lane.b32.xlu0 %v2069_v6, %s1798_s21  ;;  %v657_v41 = vmul.f32 %v2069_v6, %v579_v10  ;;  %v680_v61 = vpack.c.bf16 %v2069_v6, %v2069_v6  ;;  %s2271_s1 = sld [smem:[#allocation26_spill]]  ;;  %s1408_s21 = sshll.u32 %s1916_s25, 6 }
 0x13d   : > { %v645_v8 = vpop.f32.mrf.mxu0 }
 0x13f   : > { %v1441_v9 = vpop.f32.mrf.mxu0 }
 0x140   : > { %649 = vrot.lane.b32.xlu1 %v2069_v6, %s1799_s0  ;;  %663 = vrot.lane.b32.xlu0 %v2069_v6, %s1800_s26  ;;  %s574_s0 = scalar_lea.vmem [#allocation11], %s1375_s24 }
 0x141   : > { %s1267_s26 = sshll.u32 %s574_s0, 4  ;;  %s1268_s26 = int_to_ptr.vmem [resolvable:$true] %s1267_s26 }
 0x144   : > { %668 = vrot.lane.b32.xlu0 %v579_v10, %s1801_s19 }
 0x148   : > { %811 = vrot.lane.b32.xlu0 %v579_v10, %s1802_s28 }
 0x14c   : > { %797 = vrot.lane.b32.xlu0 %v579_v10, %s1803_s16 }
 0x1ae   : > { %v661_v11 = vpop.permute.xlu0 %660  ;;  %v808_v12 = vpop.permute.xlu1 %807 }
 0x1af   : > { %v810_v17 = vsel %vm655_vm2, %v808_v12, %v661_v11 }
 0x1b0   : > { %v815_v19 = vmul.f32 %v810_v17, %v580_v14 }
 0x1b2   : > { %v664_v13 = vpop.permute.xlu0 %663  ;;  %v650_v18 = vpop.permute.xlu1 %649 }
 0x1b3   : > { %v666_v15 = vsel %vm655_vm2, %v661_v11, %v664_v13  ;;  %v796_v20 = vsel %vm655_vm2, %v664_v13, %v650_v18 }
 0x1b4   : > { %v672_v16 = vmul.f32 %v666_v15, %v580_v14  ;;  %v801_v21 = vmul.f32 %v796_v20, %v580_v14 }
 0x1b6   : > { %674 = vrot.lane.b32.xlu1 %v672_v16, %s1801_s19  ;;  %v669_v22 = vpop.permute.xlu0 %668 }
 0x1b7   : > { %v671_v24 = vmul.f32 %v669_v22, %v2069_v6  ;;  %v1587_v22 = vld [vmem:[%s2219_s6 + $0x8] sm:$0xff]  }
 0x1ba   : > { %817 = vrot.lane.b32.xlu1 %v815_v19, %s1802_s28  ;;  %v812_v23 = vpop.permute.xlu0 %811 }
 0x1bb   : > { %v814_v27 = vmul.f32 %v812_v23, %v2069_v6 }
 0x1be   : > { %803 = vrot.lane.b32.xlu1 %v801_v21, %s1803_s16  ;;  %v798_v29 = vpop.permute.xlu0 %797 }
 0x1bf   : > { %v800_v32 = vmul.f32 %v798_v29, %v2069_v6 }
 0x1c2   : > { %652 = vrot.lane.b32.xlu1 %v2069_v6, %s1804_s15 }
 0x228   : > { %v675_v25 = vpop.permute.xlu1 %674 }
 0x229   : > { %v677_v26 = vadd.f32 %v675_v25, %v671_v24  ;;  %v1588_v24 = vld [vmem:[%s2219_s6] sm:$0xff]  }
 0x22b   : > { %v679_v28 = vpack.c.bf16 %v677_v26, %v677_v26 }
 0x22c   : > { %v818_v30 = vpop.permute.xlu1 %817 }
 0x22d   : > { %v820_v31 = vadd.f32 %v818_v30, %v814_v27  ;;  %682 = vrot.lane.b32.xlu0 %v679_v28, %s1805_s3  ;;  %s1254_s3 = scalar_lea.sflag [#allocation5], %s2028_s23 }
 0x22f   : > { %v822_v33 = vpack.c.bf16 %v820_v31, %v820_v31 }
 0x230   : > { %v804_v34 = vpop.permute.xlu1 %803 }
 0x231   : > { %v806_v35 = vadd.f32 %v804_v34, %v800_v32  ;;  %827 = vrot.lane.b32.xlu0 %v822_v33, %s1806_s27  ;;  %s1717_s27 = scalar_lea.vmem %s1268_s26, 64 }
 0x232   : > { %p1718_p12 = scmp.ne.s32.totalorder %s1268_s26, %s1717_s27 }
 0x233   : > { %v821_v36 = vpack.c.bf16 %v806_v35, %v806_v35 }
 0x234   : > { %v653_v37 = vpop.permute.xlu1 %652  ;;  %p1719_p7 = pnand %p1718_p12, %p2273_p5 }
 0x235   : > { %824 = vrot.lane.b32.xlu1 %v821_v36, %s1807_s29  ;;  %v656_v38 = vsel %vm655_vm2, %v650_v18, %v653_v37  ;;  %v1389_v36 = vld [vmem:[%s2220_s7] ss:$0 sm:$0xff]  ;;  %v577_v37 = vunpack.c.l.bf16 %v2059_v3  ;;  %v1589_v3 = vld [vmem:[%s2223_s10 + $0x8] sm:$0xff]   ;;  %s1809_s29 = smov [#allocation11]  }
 0x236   : > { %v658_v39 = vmul.f32 %v656_v38, %v580_v14  ;;  %p1720_p10 = pneg %p1719_p7  ;;  %s1721_s25 = sshll.u32 %s1809_s29, 4  ;;  %s1722_s25 = int_to_ptr.vmem [resolvable:$false] %s1721_s25 }
 0x237   : > { %s1723_s24 = scalar_lea.vmem %s1722_s25, 128  ;;  %p1724_p13 = scmp.lt.s32.totalorder %s1268_s26, %s1722_s25 }
 0x238   : > { %v659_v43 = vadd.f32 %v658_v39, %v657_v41  ;;  %p1725_p0 = scmp.lt.s32.totalorder %s1723_s24, %s1717_s27 }
 0x23a   : > { %v678_v45 = vpack.c.bf16 %v659_v43, %v659_v43  ;;  %p1726_p1 = por %p1725_p0, %p1724_p13 }
 0x23c   : > { %p1727_p3 = pnand %p1726_p1, %p1720_p10 }
 0x29f   : > { %v683_v40 = vpop.permute.xlu0 %682 }
 0x2a0   : > { %v689_v42 = vsel %vm684_vm3, %v683_v40, 0 }
 0x2a1   : > { %1443 = vmatpush3.bf16.xpose.msra.mxu1 %v689_v42 }
 0x2a2   : > { %1454 = vmatprep.subr.bf16.mxu1 %v1795_v0 }
 0x2a3   : > { %v828_v44 = vpop.permute.xlu0 %827 }
 0x2a4   : > { %v833_v46 = vsel %vm684_vm3, %v828_v44, 0 }
 0x2a7   : > { %v825_v47 = vpop.permute.xlu1 %824 }
 0x2a8   : > { %1445 = vmatmul.mubr.msk.bf16.vlgmr.msra.gmra.mxu1 %vm684_vm3, %v678_v45 }
 0x2a9   : > { %1455 = vmatpush3.bf16.xpose.msra.mxu1 %v833_v46  ;;  %1456 = vmatprep.mubr.msk.bf16.mxu1 %vm1796_vm0, %v1795_v0 }
 0x2aa   : > { %1466 = vmatprep.subr.bf16.mxu1 %v1795_v0 }
 0x2b0   : > { %1457 = vmatmul.mubr.msk.bf16.vlgmr.msra.gmra.mxu1 %vm684_vm3, %v825_v47 }
 0x2b1   : > { %1470 = vmatprep.mubr.msk.bf16.mxu1 %vm1796_vm0, %v1795_v0  ;;  %1467 = vmatpush3.bf16.msra.mxu1 %v1587_v22 }
 0x2b2   : > { %1468 = vmatprep.subr.bf16.mxu1 %v1795_v0 }
 0x2b5   : > { %1469 = vmatpush3.bf16.msra.mxu1 %v1588_v24 }
 0x2b6   : > { %1482 = vmatprep.subr.bf16.mxu1 %v1795_v0 }
 0x368   : > { %v725_v49 = vpop.f32.mrf.mxu1 }
 0x369   : > { %v726_v50 = vadd.f32 %v725_v49, %v578_v48 }
 0x36a   : > { %v1446_v51 = vpop.f32.mrf.mxu1 }
 0x36b   : > { %v731_v52 = vsel %vm655_vm2, %v726_v50, -inf }
 0x36c   : > { %732 = vmax.xlane.f32.xlu0 %v731_v52  ;;  %v728_v53 = vpop.f32.mrf.mxu1 }
 0x36e   : > { %v1447_v54 = vpop.f32.mrf.mxu1 }
 0x370   : > { %v869_v55 = vpop.f32.mrf.mxu1 }
 0x371   : > { %v870_v56 = vadd.f32 %v869_v55, %v578_v48  ;;  %v1393_v55 = vld [vmem:[%s2221_s8] ss:$0 sm:$0xff] }
 0x372   : > { %v1458_v57 = vpop.f32.mrf.mxu1 }
 0x373   : > { %v875_v58 = vsel %vm655_vm2, %v870_v56, -inf  ;;  %v1394_v57 = vld [vmem:[%s2222_s9] ss:$0 sm:$0xff] }
 0x374   : > { %876 = vmax.xlane.f32.xlu1 %v875_v58  ;;  %v872_v59 = vpop.f32.mrf.mxu1 }
 0x376   : > { %v1459_v60 = vpop.f32.mrf.mxu1 }
 0x385   : > { %744 = vrot.lane.b32.xlu1 %v680_v61, %s1808_s18 }
 0x3f5   : > { %v733_v62 = vpop.xlane.xlu0 %732 }
 0x3f6   : > { %v734_v63 = vsub.f32 %v726_v50, %v733_v62  ;;  %v1590_v50 = vld [vmem:[%s2223_s10] sm:$0xff]   ;;  %v1592_v62 = vld [vmem:[%s2225_s12 + $0x10] sm:$0xff]  }
 0x3f8   : > { %v735_v1 = vmul.f32 1.442695, %v734_v63  ;;  %v1593_v63 = vld [vmem:[%s2225_s12 + $0x8] sm:$0xff]  }
 0x3fa   : > { %1595 = vpow2.f32 %v735_v1  ;;  %v1594_v1 = vld [vmem:[%s2225_s12] sm:$0xff]  }
 0x3fd   : > { %v877_v2 = vpop.xlane.xlu1 %876 }
 0x3fe   : > { %v878_v4 = vsub.f32 %v870_v56, %v877_v2  ;;  %v1395_v2 = vld [vmem:[%s2224_s11] ss:$0 sm:$0xff] }
 0x400   : > { %v879_v5 = vmul.f32 1.442695, %v878_v4 }
 0x401   : > { %v745_v7 = vpop.permute.xlu1 %744 }
 0x402   : > { %1597 = vpow2.f32 %v879_v5  ;;  %v751_v8 = vsel %vm749_vm4, %v745_v7, 0 }
 0x403   : > { %1449 = vmatpush3.bf16.msra.mxu0 %v751_v8 }
 0x404   : > { %1460 = vmatprep.subr.bf16.mxu0 %v1795_v0 }
 0x407   : > { %v1596_v9 = vpop.eup %1595 }
 0x408   : > { %v737_v6 = vsel %vm655_vm2, %v1596_v9, 0.0 }
 0x409   : > { %738 = vadd.xlane.f32.xlu0 %v737_v6 }
 0x40f   : > { %v1598_v10 = vpop.eup %1597 }
 0x410   : > { %v881_v11 = vsel %vm655_vm2, %v1598_v10, 0.0 }
 0x411   : > { %882 = vadd.xlane.f32.xlu0 %v881_v11 }
 0x427   : > { %887 = vrot.lane.b32.xlu0 %v680_v61, %s1802_s28  ;;  %v1591_v61 = vld [vmem:[%s2225_s12 + $0x18] sm:$0xff]  }
 0x492   : > { %v739_v12 = vpop.xlane.xlu0 %738 }
 0x493   : > { %1599 = vrcp.f32 %v739_v12 }
 0x49a   : > { %v883_v13 = vpop.xlane.xlu0 %882 }
 0x49b   : > { %1601 = vrcp.f32 %v883_v13 }
 0x49e   : > { %v888_v16 = vpop.permute.xlu0 %887 }
 0x49f   : > { %v893_v18 = vsel %vm749_vm4, %v888_v16, 0 }
 0x4a0   : > { %v1600_v14 = vpop.eup %1599 }
 0x4a1   : > { %v741_v15 = vmul.f32 %v1600_v14, %v1596_v9 }
 0x4a3   : > { %v742_v17 = vpack.c.bf16 %v741_v15, %v741_v15 }
 0x4a5   : > { %1451 = vmatmul.mubr.msk.bf16.vlgmr.msra.gmra.mxu0 %vm655_vm2, %v742_v17 }
 0x4a6   : > { %1461 = vmatpush3.bf16.msra.mxu0 %v893_v18  ;;  %1462 = vmatprep.mubr.msk.bf16.mxu0 %vm1796_vm0, %v1795_v0 }
 0x4a7   : > { %1474 = vmatprep.subr.bf16.mxu0 %v1795_v0 }
 0x4a8   : > { %v1602_v19 = vpop.eup %1601 }
 0x4a9   : > { %v885_v20 = vmul.f32 %v1602_v19, %v1598_v10 }
 0x4ab   : > { %v886_v21 = vpack.c.bf16 %v885_v20, %v885_v20 }
 0x4ad   : > { %1463 = vmatmul.mubr.msk.bf16.vlgmr.msra.gmra.mxu0 %vm655_vm2, %v886_v21 }
 0x4ae   : > { %1478 = vmatprep.mubr.msk.bf16.mxu0 %vm1796_vm0, %v1795_v0  ;;  %1475 = vmatpush3.bf16.msra.mxu0 %v1589_v3 }
 0x4af   : > { %1476 = vmatprep.subr.bf16.mxu0 %v1795_v0 }
 0x4b2   : > { %1477 = vmatpush3.bf16.msra.mxu0 %v1590_v50  ;;  %v1405_v50 = vld [vmem:[%s2227_s14] ss:$0 sm:$0xff] }
 0x565   : > { %v787_v23 = vpop.f32.mrf.mxu0 }
 0x566   : > { %v793_v25 = vpack.c.bf16 %v787_v23, %v787_v23 }
 0x567   : > { %v1452_v26 = vpop.f32.mrf.mxu0 }
 0x568   : > { %795 = vst.msk [vmem:[#allocation2] sm:$0xf] %vm794_vm5, %v793_v25 }
 0x569   : > { %v790_v27 = vpop.f32.mrf.mxu0 }
 0x56b   : > { %v1453_v28 = vpop.f32.mrf.mxu0 }
 0x56d   : > { %v929_v29 = vpop.f32.mrf.mxu0 }
 0x56e   : > { %v1411_v30 = vpack.c.bf16 %v929_v29, %v929_v29 }
 0x56f   : > { %v1464_v31 = vpop.f32.mrf.mxu0 }
 0x570   : > { %939 = vrot.lane.b32.xlu1 %v1411_v30, %s1803_s16  ;;  %s2272_s16 = sld [smem:[#allocation27_spill]] }
 0x571   : > { %v932_v32 = vpop.f32.mrf.mxu0 }
 0x573   : > { %v1465_v33 = vpop.f32.mrf.mxu0 }
 0x576   : > { %s1265_s15 = scalar_lea.hbm %s2272_s16, %s1408_s21 }
 0x5e2   : > { %v940_v34 = vpop.permute.xlu1 %939 }
 0x5e3   : > { %943 = vst.msk [vmem:[#allocation2] sm:$0xf] %vm942_vm6, %v940_v34  ;;  %v1399_v34 = vld [vmem:[%s2226_s13] ss:$0 sm:$0xff] }
 0x5ea   : > { %v944_v35 = vld [vmem:[#allocation2] sm:$0xf] }
 0x5eb   : > { %1471 = vmatmul.mubr.msk.bf16.vlgmr.msra.gmra.mxu1 %vm604_vm1, %v944_v35 }
 0x5ec   : > { %1490 = vmatprep.mubr.msk.bf16.mxu1 %vm1796_vm0, %v1795_v0  ;;  %1483 = vmatpush3.bf16.msra.mxu1 %v1591_v61 }
 0x5ed   : > { %1484 = vmatprep.subr.bf16.mxu1 %v1795_v0 }
 0x5f0   : > { %1485 = vmatpush3.bf16.msra.mxu1 %v1592_v62 }
 0x5f1   : > { %1486 = vmatprep.subr.bf16.mxu1 %v1795_v0 }
 0x5f4   : > { %1487 = vmatpush3.bf16.msra.mxu1 %v1593_v63 }
 0x5f5   : > { %1488 = vmatprep.subr.bf16.mxu1 %v1795_v0 }
 0x5f8   : > { %1489 = vmatpush3.bf16.msra.mxu1 %v1594_v1 }
 0x6ab   : > { %v1005_v38 = vpop.f32.mrf.mxu1 }
 0x6ac   : > { %v1006_v39 = vadd.f32 %v1389_v36, %v1005_v38 }
 0x6ad   : > { %v1472_v40 = vpop.f32.mrf.mxu1 }
 0x6ae   : > { %v1011_v41 = vadd.f32 %v1006_v39, %v577_v37 }
 0x6af   : > { %v1008_v42 = vpop.f32.mrf.mxu1 }
 0x6b0   : > { %v1014_v43 = vsel %vm604_vm1, %v1011_v41, 0.0 }
 0x6b1   : > { %v1473_v44 = vpop.f32.mrf.mxu1  ;;  %1015 = vadd.xlane.f32.xlu1 %v1014_v43 }
 0x73a   : > { %v1016_v45 = vpop.xlane.xlu1 %1015 }
 0x73b   : > { %v1018_v46 = vmul.f32 0.03125, %v1016_v45 }
 0x73d   : > { %v1019_v47 = vsub.f32 %v1011_v41, %v1018_v46 }
 0x73f   : > { %v1020_v48 = vmul.f32 %v1019_v47, %v1019_v47 }
 0x741   : > { %v1021_v49 = vsel %vm604_vm1, %v1020_v48, 0.0 }
 0x742   : > { %1022 = vadd.xlane.f32.xlu0 %v1021_v49 }
 0x7cb   : > { %v1023_v51 = vpop.xlane.xlu0 %1022 }
 0x7cc   : > { %v1024_v52 = vmul.f32 0.03125, %v1023_v51 }
 0x7ce   : > { %v1025_v53 = vadd.f32 1e-12, %v1024_v52  ;;  %v1406_v52 = vld [vmem:[%s2271_s1] ss:$0 sm:$0xff] }
 0x7d0   : > { %1603 = vrsqrt.f32 %v1025_v53 }
 0x7dd   : > { %v1604_v54 = vpop.eup %1603 }
 0x7de   : > { %v1027_v56 = vmul.f32 %v1604_v54, %v1019_v47 }
 0x7e0   : > { %v1034_v58 = vmul.f32 %v1393_v55, %v1027_v56 }
 0x7e2   : > { %v1041_v59 = vadd.f32 %v1394_v57, %v1034_v58 }
 0x7e4   : > { %v1042_v60 = vpack.c.bf16 %v1041_v59, %v1041_v59 }
 0x7e6   : > { %1479 = vmatmul.mubr.msk.bf16.vlgmr.msra.gmra.mxu0 %vm604_vm1, %v1042_v60 }
 0x8a6   : > { %v1103_v4 = vpop.f32.mrf.mxu0 }
 0x8a7   : > { %v1104_v5 = vadd.f32 %v1395_v2, %v1103_v4 }
 0x8a8   : > { %v1480_v7 = vpop.f32.mrf.mxu0 }
 0x8a9   : > { %v1110_v8 = vmul.f32 0.70710677, %v1104_v5  ;;  %v1109_v30 = vmul.f32 0.5, %v1104_v5 }
 0x8aa   : > { %v1106_v9 = vpop.f32.mrf.mxu0 }
 0x8ab   : > { %v1111_v6 = vand.u32 2147483647, %v1110_v8  ;;  %vm1131_vm7 = vcmp.lt.f32.partialorder %v1110_v8, 0.0 }
 0x8ac   : > { %v1481_v10 = vpop.f32.mrf.mxu0 }
 0x8ad   : > { %v1112_v11 = vmul.f32 0.3275911, %v1111_v6  ;;  %v1125_v0 = vsub.f32 0.0, %v1111_v6 }
 0x8af   : > { %v1113_v12 = vadd.f32 1.0, %v1112_v11  ;;  %v1126_v13 = vmul.f32 %v1125_v0, %v1111_v6 }
 0x8b1   : > { %1605 = vrcp.f32 %v1113_v12  ;;  %v1127_v16 = vmul.f32 1.442695, %v1126_v13 }
 0x8b3   : > { %1607 = vpow2.f32 %v1127_v16 }
 0x8be   : > { %v1606_v14 = vpop.eup %1605 }
 0x8bf   : > { %v1116_v15 = vmul.f32 1.0614054, %v1606_v14 }
 0x8c0   : > { %v1608_v25 = vpop.eup %1607 }
 0x8c1   : > { %v1117_v17 = vadd.f32 -1.4531521, %v1116_v15 }
 0x8c3   : > { %v1118_v18 = vmul.f32 %v1606_v14, %v1117_v17 }
 0x8c5   : > { %v1119_v19 = vadd.f32 1.4214138, %v1118_v18 }
 0x8c7   : > { %v1120_v20 = vmul.f32 %v1606_v14, %v1119_v19 }
 0x8c9   : > { %v1121_v21 = vadd.f32 -0.28449672, %v1120_v20 }
 0x8cb   : > { %v1122_v22 = vmul.f32 %v1606_v14, %v1121_v21 }
 0x8cd   : > { %v1123_v23 = vadd.f32 0.2548296, %v1122_v22 }
 0x8cf   : > { %v1124_v24 = vmul.f32 %v1606_v14, %v1123_v23 }
 0x8d1   : > { %v1129_v26 = vmul.f32 %v1608_v25, %v1124_v24 }
 0x8d3   : > { %v1130_v27 = vsub.f32 1.0, %v1129_v26 }
 0x8d5   : > { %v1132_v28 = vsub.f32 0.0, %v1130_v27 }
 0x8d7   : > { %v1133_v29 = vsel %vm1131_vm7, %v1132_v28, %v1130_v27 }
 0x8d8   : > { %v1134_v31 = vadd.f32 1.0, %v1133_v29 }
 0x8da   : > { %v1135_v32 = vmul.f32 %v1134_v31, %v1109_v30 }
 0x8dc   : > { %v1136_v33 = vpack.c.bf16 %v1135_v32, %v1135_v32 }
 0x8de   : > { %1491 = vmatmul.mubr.msk.bf16.vlgmr.msra.gmra.mxu1 %vm1176_vm8, %v1136_v33 }
 0x99e   : > { %v1214_v35 = vpop.f32.mrf.mxu1 }
 0x99f   : > { %v1215_v36 = vadd.f32 %v1399_v34, %v1214_v35 }
 0x9a0   : > { %v1492_v37 = vpop.f32.mrf.mxu1 }
 0x9a1   : > { %v1220_v38 = vadd.f32 %v1215_v36, %v1041_v59 }
 0x9a2   : > { %v1217_v39 = vpop.f32.mrf.mxu1 }
 0x9a3   : > { %v1223_v40 = vsel %vm604_vm1, %v1220_v38, 0.0 }
 0x9a4   : > { %1224 = vadd.xlane.f32.xlu0 %v1223_v40  ;;  %v1493_v41 = vpop.f32.mrf.mxu1 }
 0xa2d   : > { %v1225_v42 = vpop.xlane.xlu0 %1224 }
 0xa2e   : > { %v1226_v43 = vmul.f32 0.03125, %v1225_v42 }
 0xa30   : > { %v1227_v44 = vsub.f32 %v1220_v38, %v1226_v43 }
 0xa32   : > { %v1228_v45 = vmul.f32 %v1227_v44, %v1227_v44 }
 0xa34   : > { %v1229_v46 = vsel %vm604_vm1, %v1228_v45, 0.0 }
 0xa35   : > { %1230 = vadd.xlane.f32.xlu1 %v1229_v46 }
 0xabe   : > { %v1231_v47 = vpop.xlane.xlu1 %1230 }
 0xabf   : > { %v1232_v48 = vmul.f32 0.03125, %v1231_v47 }
 0xac1   : > { %v1233_v49 = vadd.f32 1e-12, %v1232_v48 }
 0xac3   : > { %1609 = vrsqrt.f32 %v1233_v49 }
 0xad0   : > { %v1610_v3 = vpop.eup %1609 }
 0xad1   : > { %v1235_v51 = vmul.f32 %v1610_v3, %v1227_v44 }
 0xad3   : > { %v1242_v53 = vmul.f32 %v1405_v50, %v1235_v51 }
 0xad5   : > { %v1249_v54 = vadd.f32 %v1406_v52, %v1242_v53 }
 0xad7   : > { %v1250_v55 = vpack.c.bf16 %v1249_v54, %v1249_v54 }
 0xad9   : > { %1252 = vst.msk [vmem:[%s574_s0] sm:$0xf] %vm1251_vm9, %v1250_v55 }
 0xada   : > { %1730 = shalt.err (!%p1727_p3)
}
 0xadb   : > { %s1731_s18 = scalar_lea.hbm %s1265_s15, 64  ;;  %s1735_s17 = scalar_lea.hbm %s2272_s16, 128 }
 0xadc   : > { %p1732_p4 = scmp.ne.s32.totalorder %s1265_s15, %s1731_s18  ;;  %p1736_p11 = scmp.lt.s32.totalorder %s1265_s15, %s2272_s16 }
 0xadd   : > { %p1737_p6 = scmp.lt.s32.totalorder %s1735_s17, %s1731_s18 }
 0xade   : > { %p1733_p2 = pnand %p1732_p4, %p2273_p5 }
 0xadf   : > { %p1738_p8 = por %p1737_p6, %p1736_p11 }
 0xae0   : > { %p1734_p9 = pneg %p1733_p2 }
 0xae2   : > { %p1739_p12 = pnand %p1738_p8, %p1734_p9 }
 0xae4   : > { %1742 = shalt.err (!%p1739_p12)
}
 0xae5   : > { %1508 = dma.vmem_to_hbm [thread:$0]  (%p2273_p5), %s1268_s26, 64, %s1265_s15, %s1254_s3  }
 0xae6 PF: > { %s2274_s0 = sld [smem:[#allocation16_spill]] }
 0xae7   : > { %s2275_s19 = sld [smem:[#allocation19_spill]] }
 0xae8   : > { %s2276_s28 = sld [smem:[#allocation18_spill]] }
 0xaec   : > { %s1279_s27 = sand.u32 1, %s2274_s0  }
 0xaed   : > { %p2277_p7 = scmp.ne.s32.totalorder %s2275_s19, 0  ;;  %s1280_s29 = scalar_lea.sflag [#allocation5], %s1279_s27 }
 0xaee   : > { %p2278_p10 = scmp.ge.s32.totalorder %s2276_s28, 2 }
 0xaf0   : > { %p1525_p13 = pnand %p2278_p10, %p2277_p7 }
 0xaf2   : > { %p1526_p0 = pneg %p1525_p13 }
 0xaf4   : > { %1772 = dma.done.wait (%p1526_p0), %s1280_s29, 64  }
 0xaf5   : > { %1774 = vsyncadd (%p1526_p0), %s1280_s29, 4294967232  ;;  %s2279_s24 = sld [smem:[#allocation20_spill]]  ;;  %s2282_s21 = smov %s1781_s22 }
 0xaf6   : > { %s2280_s25 = sld [smem:[#allocation17_spill]] }
 0xaf7   : > { %s2281_s23 = sld [smem:[#allocation21_spill]] }
 0xafb   : > { %p31_p1 = scmp.ge.s32.totalorder %s2279_s24, 4  }
 0xafc   : > { %s2283_s22 = smov %s2280_s25 }
 0xafd   :  { %33 = sbr.rel (!%p31_p1) target bundleno = 14 (0xe), region = 141 }
 0xb02   :  { %1285 = vsyncpa [#allocation4], 1 }
 0xb03   :  { %1287 = vsyncpa [#allocation4 + $0x1], 1 }
 0xb04   :  { %1288 = vsyncpa [#allocation7], 1 }
 0xb05   :  { %1289 = vsyncpa [#allocation10], 1 }
 0xb06   :  { %1290 = vsyncpa [#allocation5], 1 }
 0xb07   :  { %1292 = vsyncpa [#allocation5 + $0x1], 1 }

</bundles_post_ra>
